<compile_context>
chip_gen: v6e
topology: v6e:2x2x1
jax: 0.10.0
libtpu: 0.0.40
codegen_flags: <defaults>
</compile_context>

<pallas_src>
import jax
import jax.numpy as jnp
from jax.experimental import pallas as pl
from jax.experimental.pallas import tpu as pltpu

K_RAW = 28 * 28      # 784
K_PAD = 896          # 7 * 128 (lane-aligned reduction dim for layer 1)
H = 512              # hidden width
N_OUT = 10           # logits
N_PAD = 128          # lane-aligned output width


def _round_up(n, m):
    return ((n + m - 1) // m) * m


def _mlp_kernel(x_ref, w1_ref, b1_ref, w2_ref, b2_ref, w3_ref, b3_ref, o_ref):
    # Layer 1: (TB, 896) @ (896, 512) -> f32 accum; bias + ReLU in f32.
    h1 = jnp.dot(x_ref[...], w1_ref[...], preferred_element_type=jnp.float32)
    h1 = jnp.maximum(h1 + b1_ref[...], 0.0)
    # Layer 2: cast activation to bf16 only for the MXU operand.
    h2 = jnp.dot(h1.astype(jnp.bfloat16), w2_ref[...],
                 preferred_element_type=jnp.float32)
    h2 = jnp.maximum(h2 + b2_ref[...], 0.0)
    # Layer 3: (TB, 512) @ (512, 128) -> padded logits.
    logits = jnp.dot(h2.astype(jnp.bfloat16), w3_ref[...],
                     preferred_element_type=jnp.float32)
    o_ref[...] = (logits + b3_ref[...]).astype(o_ref.dtype)


def prepare_params(params):
    """One-time cast/pad of the f32 torch-layout params for the kernel.

    Returns bf16 weights (K-padded / N-padded) and f32 biases (N-padded).
    """
    w1, b1, w2, b2, w3, b3 = params
    w1_p = jnp.zeros((K_PAD, H), jnp.bfloat16).at[:K_RAW, :].set(
        w1.astype(jnp.bfloat16))
    w2_p = w2.astype(jnp.bfloat16)
    w3_p = jnp.zeros((H, N_PAD), jnp.bfloat16).at[:, :N_OUT].set(
        w3.astype(jnp.bfloat16))
    b1_p = b1.astype(jnp.float32).reshape(1, H)
    b2_p = b2.astype(jnp.float32).reshape(1, H)
    b3_p = jnp.zeros((1, N_PAD), jnp.float32).at[:, :N_OUT].set(
        b3.astype(jnp.float32).reshape(1, N_OUT))
    return (w1_p, b1_p, w2_p, b2_p, w3_p, b3_p)


def mlp_forward(x, prepared_params):
    """x: (B, 1, 28, 28) or (B, 28, 28) float32. Returns (B, 10) f32 logits."""
    w1, b1, w2, b2, w3, b3 = prepared_params
    B = x.shape[0]
    x_flat = x.reshape(B, -1)  # nn.Flatten: flatten all dims except batch
    assert x_flat.shape[1] == K_RAW

    # Batch tile: big enough to feed the MXU / amortize per-step overhead,
    # small enough that tiny batches don't over-pad.
    TB = min(256, _round_up(B, 8))
    B_pad = _round_up(B, TB)

    # Zero-pad batch and K; cast the x operand to bf16 (halves its DMA bytes).
    x_p = jnp.zeros((B_pad, K_PAD), jnp.bfloat16)
    x_p = x_p.at[:B, :K_RAW].set(x_flat.astype(jnp.bfloat16))

    grid = (B_pad // TB,)

    bytes_accessed = (
        x_p.size * 2                               # bf16 input
        + (w1.size + w2.size + w3.size) * 2        # bf16 weights
        + (b1.size + b2.size + b3.size) * 4        # f32 biases
        + B_pad * N_PAD * 4                        # f32 output
    )
    cost = pl.CostEstimate(
        flops=2 * B_pad * (K_PAD * H + H * H + H * N_PAD),
        transcendentals=0,
        bytes_accessed=bytes_accessed,
    )

    out = pl.pallas_call(
        _mlp_kernel,
        out_shape=jax.ShapeDtypeStruct((B_pad, N_PAD), jnp.float32),
        grid=grid,
        in_specs=[
            pl.BlockSpec((TB, K_PAD), lambda i: (i, 0)),   # x: tiled over batch
            pl.BlockSpec((K_PAD, H), lambda i: (0, 0)),    # w1: VMEM-resident
            pl.BlockSpec((1, H), lambda i: (0, 0)),        # b1
            pl.BlockSpec((H, H), lambda i: (0, 0)),        # w2
            pl.BlockSpec((1, H), lambda i: (0, 0)),        # b2
            pl.BlockSpec((H, N_PAD), lambda i: (0, 0)),    # w3 (N-padded)
            pl.BlockSpec((1, N_PAD), lambda i: (0, 0)),    # b3 (N-padded)
        ],
        out_specs=pl.BlockSpec((TB, N_PAD), lambda i: (i, 0)),
        compiler_params=pltpu.CompilerParams(
            dimension_semantics=("parallel",)),
        cost_estimate=cost,
    )(x_p, w1, b1, w2, b2, w3, b3)

    # Slice back to the public (B, 10) logits.
    return out[:B, :N_OUT]


def init_params(key):
    """Deterministic init mimicking torch.nn.Linear default U(-1/sqrt(fan_in), +)."""
    def linear(key, fan_in, fan_out):
        kw, kb = jax.random.split(key)
        bound = 1.0 / jnp.sqrt(fan_in)
        w = jax.random.uniform(kw, (fan_in, fan_out), jnp.float32, -bound, bound)
        b = jax.random.uniform(kb, (1, fan_out), jnp.float32, -bound, bound)
        return w, b

    k1, k2, k3 = jax.random.split(key, 3)
    w1, b1 = linear(k1, K_RAW, H)
    w2, b2 = linear(k2, H, H)
    w3, b3 = linear(k3, H, N_OUT)
    return (w1, b1, w2, b2, w3, b3)


if __name__ == "__main__":
    key = jax.random.PRNGKey(0)
    k_params, k_x = jax.random.split(key)

    params = init_params(k_params)
    prepared = prepare_params(params)
    x = jax.random.normal(k_x, (2, 1, 28, 28), jnp.float32)  # small MNIST-like batch

    logits = jax.jit(mlp_forward)(x, prepared)
    logits = jax.block_until_ready(logits)

    # Sanity check against the plain-JAX f32 reference (loose tolerance since
    # the kernel's matmul operands are bf16 with f32 accumulation).
    w1, b1, w2, b2, w3, b3 = params
    xf = x.reshape(x.shape[0], -1)
    ref = jnp.maximum(xf @ w1 + b1, 0.0)
    ref = jnp.maximum(ref @ w2 + b2, 0.0)
    ref = ref @ w3 + b3
    assert logits.shape == (2, 10)
    assert bool(jnp.all(jnp.isfinite(logits)))
    assert jnp.allclose(logits, ref, atol=3e-2, rtol=3e-2)

    print("KERNEL_OK")
</pallas_src>

<mosaic_0001>
module attributes {stable_mosaic.version = 11 : i64} {
  func.func @_mlp_kernel(%arg0: i32, %arg1: memref<8x896xbf16, #tpu.memory_space<vmem>>, %arg2: memref<896x512xbf16, #tpu.memory_space<vmem>>, %arg3: memref<1x512xf32, #tpu.memory_space<vmem>>, %arg4: memref<512x512xbf16, #tpu.memory_space<vmem>>, %arg5: memref<1x512xf32, #tpu.memory_space<vmem>>, %arg6: memref<512x128xbf16, #tpu.memory_space<vmem>>, %arg7: memref<1x128xf32, #tpu.memory_space<vmem>>, %arg8: memref<8x128xf32, #tpu.memory_space<vmem>>) attributes {dimension_semantics = [#tpu.dimension_semantics<parallel>], iteration_bounds = array<i64: 1>, scalar_prefetch = 0 : i64, scratch_operands = 0 : i64, tpu.core_type = #tpu.core_type<tc>, window_params = [{transform_indices = @transform_0, window_bounds = array<i64: 8, 896>}, {pipeline_mode = #tpu.pipeline_mode<synchronous>, transform_indices = @transform_1, window_bounds = array<i64: 896, 512>}, {pipeline_mode = #tpu.pipeline_mode<synchronous>, transform_indices = @transform_2, window_bounds = array<i64: 1, 512>}, {pipeline_mode = #tpu.pipeline_mode<synchronous>, transform_indices = @transform_3, window_bounds = array<i64: 512, 512>}, {pipeline_mode = #tpu.pipeline_mode<synchronous>, transform_indices = @transform_4, window_bounds = array<i64: 1, 512>}, {pipeline_mode = #tpu.pipeline_mode<synchronous>, transform_indices = @transform_5, window_bounds = array<i64: 512, 128>}, {pipeline_mode = #tpu.pipeline_mode<synchronous>, transform_indices = @transform_6, window_bounds = array<i64: 1, 128>}, {transform_indices = @transform_7, window_bounds = array<i64: 8, 128>}]} {
    %c0 = arith.constant 0 : index
    %c0_0 = arith.constant 0 : index
    %0 = vector.load %arg1[%c0, %c0_0] : memref<8x896xbf16, #tpu.memory_space<vmem>>, vector<8x896xbf16>
    %c0_1 = arith.constant 0 : index
    %c0_2 = arith.constant 0 : index
    %1 = vector.load %arg2[%c0_1, %c0_2] : memref<896x512xbf16, #tpu.memory_space<vmem>>, vector<896x512xbf16>
    %cst = arith.constant dense<0.000000e+00> : vector<8x512xf32>
    %2 = tpu.matmul %0, %1, %cst {dimension_numbers = #tpu.dot_dimension_numbers<[1], [0], [0], [1], [0, 0, 1, 1], [], []>} : vector<8x896xbf16>, vector<896x512xbf16>, vector<8x512xf32> -> vector<8x512xf32>
    %c0_3 = arith.constant 0 : index
    %c0_4 = arith.constant 0 : index
    %3 = vector.load %arg3[%c0_3, %c0_4] : memref<1x512xf32, #tpu.memory_space<vmem>>, vector<1x512xf32>
    %4 = vector.broadcast %3 : vector<1x512xf32> to vector<8x512xf32>
    %5 = arith.addf %2, %4 : vector<8x512xf32>
    %cst_5 = arith.constant 0.000000e+00 : f32
    %6 = vector.broadcast %cst_5 : f32 to vector<8x512xf32>
    %7 = arith.maximumf %5, %6 : vector<8x512xf32>
    %8 = arith.truncf %7 : vector<8x512xf32> to vector<8x512xbf16>
    %c0_6 = arith.constant 0 : index
    %c0_7 = arith.constant 0 : index
    %9 = vector.load %arg4[%c0_6, %c0_7] : memref<512x512xbf16, #tpu.memory_space<vmem>>, vector<512x512xbf16>
    %cst_8 = arith.constant dense<0.000000e+00> : vector<8x512xf32>
    %10 = tpu.matmul %8, %9, %cst_8 {dimension_numbers = #tpu.dot_dimension_numbers<[1], [0], [0], [1], [0, 0, 1, 1], [], []>} : vector<8x512xbf16>, vector<512x512xbf16>, vector<8x512xf32> -> vector<8x512xf32>
    %c0_9 = arith.constant 0 : index
    %c0_10 = arith.constant 0 : index
    %11 = vector.load %arg5[%c0_9, %c0_10] : memref<1x512xf32, #tpu.memory_space<vmem>>, vector<1x512xf32>
    %12 = vector.broadcast %11 : vector<1x512xf32> to vector<8x512xf32>
    %13 = arith.addf %10, %12 : vector<8x512xf32>
    %cst_11 = arith.constant 0.000000e+00 : f32
    %14 = vector.broadcast %cst_11 : f32 to vector<8x512xf32>
    %15 = arith.maximumf %13, %14 : vector<8x512xf32>
    %16 = arith.truncf %15 : vector<8x512xf32> to vector<8x512xbf16>
    %c0_12 = arith.constant 0 : index
    %c0_13 = arith.constant 0 : index
    %17 = vector.load %arg6[%c0_12, %c0_13] : memref<512x128xbf16, #tpu.memory_space<vmem>>, vector<512x128xbf16>
    %cst_14 = arith.constant dense<0.000000e+00> : vector<8x128xf32>
    %18 = tpu.matmul %16, %17, %cst_14 {dimension_numbers = #tpu.dot_dimension_numbers<[1], [0], [0], [1], [0, 0, 1, 1], [], []>} : vector<8x512xbf16>, vector<512x128xbf16>, vector<8x128xf32> -> vector<8x128xf32>
    %c0_15 = arith.constant 0 : index
    %c0_16 = arith.constant 0 : index
    %19 = vector.load %arg7[%c0_15, %c0_16] : memref<1x128xf32, #tpu.memory_space<vmem>>, vector<1x128xf32>
    %20 = vector.broadcast %19 : vector<1x128xf32> to vector<8x128xf32>
    %21 = arith.addf %18, %20 : vector<8x128xf32>
    %c0_17 = arith.constant 0 : index
    %c0_18 = arith.constant 0 : index
    %22 = vector.load %arg8[%c0_17, %c0_18] : memref<8x128xf32, #tpu.memory_space<vmem>>, vector<8x128xf32>
    tpu.vector_store %arg8[%c0_17, %c0_18], %21 {strides = array<i32>} : memref<8x128xf32, #tpu.memory_space<vmem>>, vector<8x128xf32>,
    return
  }
  func.func @transform_0(%arg0: i32) -> (i32, i32) {
    %c0_i32 = arith.constant 0 : i32
    %c0_i32_0 = arith.constant 0 : i32
    return %arg0, %c0_i32 : i32, i32
  }
  func.func @transform_1(%arg0: i32) -> (i32, i32) {
    %c0_i32 = arith.constant 0 : i32
    %c0_i32_0 = arith.constant 0 : i32
    %c0_i32_1 = arith.constant 0 : i32
    return %c0_i32, %c0_i32_0 : i32, i32
  }
  func.func @transform_2(%arg0: i32) -> (i32, i32) {
    %c0_i32 = arith.constant 0 : i32
    %c0_i32_0 = arith.constant 0 : i32
    %c0_i32_1 = arith.constant 0 : i32
    return %c0_i32, %c0_i32_0 : i32, i32
  }
  func.func @transform_3(%arg0: i32) -> (i32, i32) {
    %c0_i32 = arith.constant 0 : i32
    %c0_i32_0 = arith.constant 0 : i32
    %c0_i32_1 = arith.constant 0 : i32
    return %c0_i32, %c0_i32_0 : i32, i32
  }
  func.func @transform_4(%arg0: i32) -> (i32, i32) {
    %c0_i32 = arith.constant 0 : i32
    %c0_i32_0 = arith.constant 0 : i32
    %c0_i32_1 = arith.constant 0 : i32
    return %c0_i32, %c0_i32_0 : i32, i32
  }
  func.func @transform_5(%arg0: i32) -> (i32, i32) {
    %c0_i32 = arith.constant 0 : i32
    %c0_i32_0 = arith.constant 0 : i32
    %c0_i32_1 = arith.constant 0 : i32
    return %c0_i32, %c0_i32_0 : i32, i32
  }
  func.func @transform_6(%arg0: i32) -> (i32, i32) {
    %c0_i32 = arith.constant 0 : i32
    %c0_i32_0 = arith.constant 0 : i32
    %c0_i32_1 = arith.constant 0 : i32
    return %c0_i32, %c0_i32_0 : i32, i32
  }
  func.func @transform_7(%arg0: i32) -> (i32, i32) {
    %c0_i32 = arith.constant 0 : i32
    %c0_i32_0 = arith.constant 0 : i32
    return %arg0, %c0_i32 : i32, i32
  }
}

</mosaic_0001>

<bundles_post_ra>
// kernel: mlp_forward.1
= control target key start
LH: loop header
LB: loop body
LE: loop exit
PB: predicated region body
PF: predicated region fallthrough
CT: control target
= control target key end

     0   :  { %12 = vsyncpa [#allocation3], 0  ;;  %s4351_s0 = inlined_call_operand.vmem [shape: bf16[8,896], index: 0, kind: input, shape index: {}]   ;;  %s4352_s1 = inlined_call_operand.hbm [shape: bf16[896,512], index: 1, kind: input, shape index: {}]   ;;  %s4353_s2 = inlined_call_operand.vmem [shape: f32[1,512], index: 2, kind: input, shape index: {}]   ;;  %s4354_s3 = inlined_call_operand.hbm [shape: bf16[512,512], index: 3, kind: input, shape index: {}]   ;;  %s4355_s4 = inlined_call_operand.vmem [shape: f32[1,512], index: 4, kind: input, shape index: {}]   ;;  %s4356_s5 = inlined_call_operand.hbm [shape: bf16[512,128], index: 5, kind: input, shape index: {}]   ;;  %s4357_s6 = inlined_call_operand.vmem [shape: f32[1,128], index: 6, kind: input, shape index: {}]   ;;  %s4358_s7 = inlined_call_operand.vmem [shape: f32[8,128], index: 7, kind: output, shape index: {}]  }
   0x1   :  { %13 = vsyncpa [#allocation5], 0  ;;  %s4187_s24 = smov [#allocation4]   ;;  %s4188_s26 = smov [#allocation2]  }
   0x2   :  { %s35_s25 = sshll.u32 %s4187_s24, 4  ;;  %s21_s27 = sshll.u32 %s4188_s26, 4  ;;  %s36_s25 = int_to_ptr.vmem [resolvable:$true] %s35_s25  ;;  %s22_s27 = int_to_ptr.vmem [resolvable:$true] %s21_s27 }
   0x3   :  { %s4131_s28 = scalar_lea.vmem %s36_s25, 16384  ;;  %p4136_p1 = scmp.lt.s32.totalorder %s36_s25, %s36_s25 }
   0x4   :  { %p4132_p0 = scmp.ne.s32.totalorder %s36_s25, %s4131_s28  ;;  %p4137_p2 = scmp.lt.s32.totalorder %s4131_s28, %s4131_s28 }
   0x6   :  { %p4138_p3 = por %p4137_p2, %p4136_p1 }
   0x8   :  { %p4139_p4 = pnand %p4138_p3, %p4132_p0 }
   0xa   :  { %4142 = shalt.err (!%p4139_p4)
}
   0xb   :  { %s4189_s29 = smov 256   ;;  %s4190_s30 = smov 16  }
   0xc   :  { %41 = dma.hbm_to_vmem [thread:$0]  %s4354_s3, 16384, %s36_s25, [#allocation5], %s4189_s29, %s4189_s29, %s4190_s30  }
   0xd   :  { %s4151_s10 = scalar_lea.vmem %s22_s27, 28672  ;;  %p4156_p6 = scmp.lt.s32.totalorder %s22_s27, %s22_s27 }
   0xe   :  { %p4152_p5 = scmp.ne.s32.totalorder %s22_s27, %s4151_s10  ;;  %p4157_p7 = scmp.lt.s32.totalorder %s4151_s10, %s4151_s10 }
  0x10   :  { %p4158_p8 = por %p4157_p7, %p4156_p6 }
  0x12   :  { %p4159_p9 = pnand %p4158_p8, %p4152_p5 }
  0x14   :  { %4162 = shalt.err (!%p4159_p9)
}
  0x15   :  { %27 = dma.hbm_to_vmem [thread:$0]  %s4352_s1, 28672, %s22_s27, [#allocation3], %s4189_s29, %s4189_s29, %s4190_s30  }
  0x16   :  { %s4191_s13 = smov [#allocation6]  }
  0x17   :  { %s49_s14 = sshll.u32 %s4191_s13, 4  ;;  %s50_s14 = int_to_ptr.vmem [resolvable:$true] %s49_s14 }
  0x18   :  { %s4171_s15 = scalar_lea.vmem %s50_s14, 4096  ;;  %p4176_p11 = scmp.lt.s32.totalorder %s50_s14, %s50_s14 }
  0x19   :  { %p4172_p10 = scmp.ne.s32.totalorder %s50_s14, %s4171_s15  ;;  %p4177_p12 = scmp.lt.s32.totalorder %s4171_s15, %s4171_s15 }
  0x1b   :  { %p4178_p13 = por %p4177_p12, %p4176_p11 }
  0x1d   :  { %p4179_p0 = pnand %p4178_p13, %p4172_p10 }
  0x1f   :  { %4182 = shalt.err (!%p4179_p0)
}
  0x20   :  { %s4192_s3 = smov 64   ;;  %s4193_s16 = smov 4  }
  0x21   :  { %55 = dma.hbm_to_vmem [thread:$0]  %s4356_s5, 4096, %s50_s14, [#allocation5], %s4192_s3, %s4192_s3, %s4193_s16  }
  0x22   :  { %4183 = dma.done.wait [#allocation3], 28672  }
  0x23   :  { %4184 = vsyncadd [#allocation3], 4294938624 }
  0x24   :  { %4185 = dma.done.wait [#allocation5], 20480  }
  0x25   :  { %4186 = vsyncadd [#allocation5], 4294946816  ;;  %v3555_v0 = vld [vmem:[#allocation2 + $0xe4] ss:$16 sps:$4 sm:$0xff]   ;;  %v3559_v2 = vld [vmem:[#allocation2 + $0xe0] ss:$16 sps:$4 sm:$0xff]  }
  0x26   :  { %v3557_v1 = vld [vmem:[#allocation2 + $0x2e4] ss:$16 sps:$4 sm:$0xff]   ;;  %1463 = vmatprep.subr.bf16.mxu0 %v3555_v0  ;;  %v3560_v3 = vld [vmem:[#allocation2 + $0x2e0] ss:$16 sps:$4 sm:$0xff]   ;;  %v69_v48 = vld [vmem:[%s4351_s0 + $0x8] sm:$0xff] }
  0x27   :  { %1504 = vmatprep.subr.bf16.mxu1 %v3557_v1  ;;  %v3561_v4 = vld [vmem:[#allocation2 + $0xc4] ss:$16 sps:$4 sm:$0xff]   ;;  %1464 = vmatpush1.bf16.msra.mxu0 %v3559_v2  ;;  %v3565_v6 = vld [vmem:[#allocation2 + $0xc0] ss:$16 sps:$4 sm:$0xff]   ;;  %v4252_v51 = vcombine.high %v69_v48, %v69_v48 }
  0x28   :  { %1505 = vmatpush1.bf16.msra.mxu1 %v3560_v3  ;;  %v3563_v5 = vld [vmem:[#allocation2 + $0x2c4] ss:$16 sps:$4 sm:$0xff]   ;;  %1465 = vmatprep.subr.bf16.mxu0 %v3561_v4  ;;  %v3566_v7 = vld [vmem:[#allocation2 + $0x2c0] ss:$16 sps:$4 sm:$0xff]  }
  0x29   :  { %1506 = vmatprep.subr.bf16.mxu1 %v3563_v5  ;;  %v3567_v8 = vld [vmem:[#allocation2 + $0xa4] ss:$16 sps:$4 sm:$0xff]   ;;  %v3571_v10 = vld [vmem:[#allocation2 + $0xa0] ss:$16 sps:$4 sm:$0xff]   ;;  %1536 = vmatprep.mubr.bf16.mxu1 %v4252_v51 }
  0x2a   :  { %v3569_v9 = vld [vmem:[#allocation2 + $0x2a4] ss:$16 sps:$4 sm:$0xff]   ;;  %v3572_v11 = vld [vmem:[#allocation2 + $0x2a0] ss:$16 sps:$4 sm:$0xff]  }
  0x2b   :  { %1466 = vmatpush1.bf16.msra.mxu0 %v3565_v6  ;;  %v3573_v12 = vld [vmem:[#allocation2 + $0x84] ss:$16 sps:$4 sm:$0xff]   ;;  %v3577_v14 = vld [vmem:[#allocation2 + $0x80] ss:$16 sps:$4 sm:$0xff]  }
  0x2c   :  { %1507 = vmatpush1.bf16.msra.mxu1 %v3566_v7  ;;  %1467 = vmatprep.subr.bf16.mxu0 %v3567_v8  ;;  %v3575_v13 = vld [vmem:[#allocation2 + $0x284] ss:$16 sps:$4 sm:$0xff]   ;;  %v3578_v15 = vld [vmem:[#allocation2 + $0x280] ss:$16 sps:$4 sm:$0xff]   ;;  %v4258_v7 = vcombine.low %v69_v48, %v69_v48  ;;  %v3715_v48 = vld [vmem:[#allocation2 + $0xcc] ss:$16 sps:$4 sm:$0xff]  }
  0x2d   :  { %1508 = vmatprep.subr.bf16.mxu1 %v3569_v9  ;;  %v3579_v16 = vld [vmem:[#allocation2 + $0x64] ss:$16 sps:$4 sm:$0xff]   ;;  %v3583_v18 = vld [vmem:[#allocation2 + $0x60] ss:$16 sps:$4 sm:$0xff]  }
  0x2e   :  { %v3581_v17 = vld [vmem:[#allocation2 + $0x264] ss:$16 sps:$4 sm:$0xff]   ;;  %v3584_v19 = vld [vmem:[#allocation2 + $0x260] ss:$16 sps:$4 sm:$0xff]  }
  0x2f   :  { %1468 = vmatpush1.bf16.msra.mxu0 %v3571_v10  ;;  %v3585_v20 = vld [vmem:[#allocation2 + $0x44] ss:$16 sps:$4 sm:$0xff]   ;;  %v3589_v22 = vld [vmem:[#allocation2 + $0x40] ss:$16 sps:$4 sm:$0xff]  }
  0x30   :  { %1509 = vmatpush1.bf16.msra.mxu1 %v3572_v11  ;;  %1469 = vmatprep.subr.bf16.mxu0 %v3573_v12  ;;  %v3587_v21 = vld [vmem:[#allocation2 + $0x244] ss:$16 sps:$4 sm:$0xff]   ;;  %v3590_v23 = vld [vmem:[#allocation2 + $0x240] ss:$16 sps:$4 sm:$0xff]  }
  0x31   :  { %1510 = vmatprep.subr.bf16.mxu1 %v3575_v13  ;;  %v3591_v24 = vld [vmem:[#allocation2 + $0x24] ss:$16 sps:$4 sm:$0xff]   ;;  %v3595_v26 = vld [vmem:[#allocation2 + $0x20] ss:$16 sps:$4 sm:$0xff]  }
  0x32   :  { %v3593_v25 = vld [vmem:[#allocation2 + $0x224] ss:$16 sps:$4 sm:$0xff]   ;;  %v3596_v27 = vld [vmem:[#allocation2 + $0x220] ss:$16 sps:$4 sm:$0xff]  }
  0x33   :  { %1470 = vmatpush1.bf16.msra.mxu0 %v3577_v14  ;;  %v3597_v28 = vld [vmem:[#allocation2 + $0x4] ss:$16 sps:$4 sm:$0xff]   ;;  %v3601_v30 = vld [vmem:[#allocation2] ss:$16 sps:$4 sm:$0xff]  }
  0x34   :  { %1511 = vmatpush1.bf16.msra.mxu1 %v3578_v15  ;;  %1471 = vmatprep.subr.bf16.mxu0 %v3579_v16  ;;  %v3599_v29 = vld [vmem:[#allocation2 + $0x204] ss:$16 sps:$4 sm:$0xff]   ;;  %v3602_v31 = vld [vmem:[#allocation2 + $0x200] ss:$16 sps:$4 sm:$0xff]   ;;  %v4194_v16 = vmov 0  }
  0x35   :  { %1512 = vmatprep.subr.bf16.mxu1 %v3581_v17  ;;  %v3603_v32 = vld [vmem:[#allocation2 + $0x1e4] ss:$16 sps:$4 sm:$0xff]   ;;  %v3607_v34 = vld [vmem:[#allocation2 + $0x1e0] ss:$16 sps:$4 sm:$0xff]  }
  0x36   :  { %v3605_v33 = vld [vmem:[#allocation2 + $0x3e4] ss:$16 sps:$4 sm:$0xff]   ;;  %v3608_v35 = vld [vmem:[#allocation2 + $0x3e0] ss:$16 sps:$4 sm:$0xff]  }
  0x37   :  { %1472 = vmatpush1.bf16.msra.mxu0 %v3583_v18  ;;  %v3609_v36 = vld [vmem:[#allocation2 + $0x1c4] ss:$16 sps:$4 sm:$0xff]   ;;  %v3613_v38 = vld [vmem:[#allocation2 + $0x1c0] ss:$16 sps:$4 sm:$0xff]  }
  0x38   :  { %1513 = vmatpush1.bf16.msra.mxu1 %v3584_v19  ;;  %1473 = vmatprep.subr.bf16.mxu0 %v3585_v20  ;;  %v3611_v37 = vld [vmem:[#allocation2 + $0x3c4] ss:$16 sps:$4 sm:$0xff]   ;;  %v3614_v39 = vld [vmem:[#allocation2 + $0x3c0] ss:$16 sps:$4 sm:$0xff]  }
  0x39   :  { %1514 = vmatprep.subr.bf16.mxu1 %v3587_v21  ;;  %v3615_v40 = vld [vmem:[#allocation2 + $0x1a4] ss:$16 sps:$4 sm:$0xff]   ;;  %v3619_v42 = vld [vmem:[#allocation2 + $0x1a0] ss:$16 sps:$4 sm:$0xff]  }
  0x3a   :  { %v3617_v41 = vld [vmem:[#allocation2 + $0x3a4] ss:$16 sps:$4 sm:$0xff]   ;;  %v3620_v43 = vld [vmem:[#allocation2 + $0x3a0] ss:$16 sps:$4 sm:$0xff]  }
  0x3b   :  { %1474 = vmatpush1.bf16.msra.mxu0 %v3589_v22  ;;  %v3621_v44 = vld [vmem:[#allocation2 + $0x184] ss:$16 sps:$4 sm:$0xff]   ;;  %v3625_v49 = vld [vmem:[#allocation2 + $0x180] ss:$16 sps:$4 sm:$0xff]  }
  0x3c   :  { %1515 = vmatpush1.bf16.msra.mxu1 %v3590_v23  ;;  %1475 = vmatprep.subr.bf16.mxu0 %v3591_v24  ;;  %v3623_v45 = vld [vmem:[#allocation2 + $0x384] ss:$16 sps:$4 sm:$0xff]   ;;  %v3626_v50 = vld [vmem:[#allocation2 + $0x380] ss:$16 sps:$4 sm:$0xff]  }
  0x3d   :  { %1516 = vmatprep.subr.bf16.mxu1 %v3593_v25  ;;  %v68_v46 = vld [vmem:[%s4351_s0] sm:$0xff] }
  0x3e   :  { %v4247_v47 = vcombine.high %v68_v46, %v68_v46  ;;  %v3627_v52 = vld [vmem:[#allocation2 + $0x164] ss:$16 sps:$4 sm:$0xff]   ;;  %v3631_v54 = vld [vmem:[#allocation2 + $0x160] ss:$16 sps:$4 sm:$0xff]   ;;  %v4256_v6 = vcombine.low %v68_v46, %v68_v46 }
  0x3f   :  { %1476 = vmatpush1.bf16.msra.mxu0 %v3595_v26  ;;  %v3629_v53 = vld [vmem:[#allocation2 + $0x364] ss:$16 sps:$4 sm:$0xff]   ;;  %v3632_v55 = vld [vmem:[#allocation2 + $0x360] ss:$16 sps:$4 sm:$0xff]  }
  0x40   :  { %1517 = vmatpush1.bf16.msra.mxu1 %v3596_v27  ;;  %1477 = vmatprep.subr.bf16.mxu0 %v3597_v28  ;;  %v3633_v56 = vld [vmem:[#allocation2 + $0x144] ss:$16 sps:$4 sm:$0xff]   ;;  %v3637_v58 = vld [vmem:[#allocation2 + $0x140] ss:$16 sps:$4 sm:$0xff]  }
  0x41   :  { %1518 = vmatprep.subr.bf16.mxu1 %v3599_v29  ;;  %1495 = vmatprep.mubr.bf16.mxu0 %v4247_v47  ;;  %v3635_v57 = vld [vmem:[#allocation2 + $0x344] ss:$16 sps:$4 sm:$0xff]   ;;  %v3638_v59 = vld [vmem:[#allocation2 + $0x340] ss:$16 sps:$4 sm:$0xff]  }
  0x42   :  { %v3639_v60 = vld [vmem:[#allocation2 + $0x124] ss:$16 sps:$4 sm:$0xff]   ;;  %v3643_v62 = vld [vmem:[#allocation2 + $0x120] ss:$16 sps:$4 sm:$0xff]  }
  0x43   :  { %1478 = vmatpush1.bf16.msra.mxu0 %v3601_v30  ;;  %v3641_v61 = vld [vmem:[#allocation2 + $0x324] ss:$16 sps:$4 sm:$0xff]   ;;  %v3644_v63 = vld [vmem:[#allocation2 + $0x320] ss:$16 sps:$4 sm:$0xff]  }
  0x44   :  { %1519 = vmatpush1.bf16.msra.mxu1 %v3602_v31  ;;  %1479 = vmatprep.subr.bf16.mxu0 %v3603_v32  ;;  %v3645_v0 = vld [vmem:[#allocation2 + $0x104] ss:$16 sps:$4 sm:$0xff]   ;;  %v3649_v2 = vld [vmem:[#allocation2 + $0x100] ss:$16 sps:$4 sm:$0xff]  }
  0x45   :  { %1520 = vmatprep.subr.bf16.mxu1 %v3605_v33  ;;  %v3647_v1 = vld [vmem:[#allocation2 + $0x304] ss:$16 sps:$4 sm:$0xff]   ;;  %v3650_v3 = vld [vmem:[#allocation2 + $0x300] ss:$16 sps:$4 sm:$0xff]  }
  0x46   :  { %v3657_v4 = vld [vmem:[#allocation2 + $0x4e4] ss:$16 sps:$4 sm:$0xff]   ;;  %v3655_v8 = vld [vmem:[#allocation2 + $0x4e0] ss:$16 sps:$4 sm:$0xff]  }
  0x47   :  { %1480 = vmatpush2.bf16.msra.mxu0 %v3607_v34  ;;  %v3660_v5 = vld [vmem:[#allocation2 + $0x6e4] ss:$16 sps:$4 sm:$0xff]   ;;  %v3658_v9 = vld [vmem:[#allocation2 + $0x6e0] ss:$16 sps:$4 sm:$0xff]  }
  0x48   :  { %1521 = vmatpush2.bf16.msra.mxu1 %v3608_v35  ;;  %1481 = vmatprep.subr.bf16.mxu0 %v3609_v36  ;;  %v3663_v10 = vld [vmem:[#allocation2 + $0x4c4] ss:$16 sps:$4 sm:$0xff]   ;;  %v3661_v12 = vld [vmem:[#allocation2 + $0x4c0] ss:$16 sps:$4 sm:$0xff]  }
  0x49   :  { %1522 = vmatprep.subr.bf16.mxu1 %v3611_v37  ;;  %v3666_v11 = vld [vmem:[#allocation2 + $0x6c4] ss:$16 sps:$4 sm:$0xff]   ;;  %v3664_v13 = vld [vmem:[#allocation2 + $0x6c0] ss:$16 sps:$4 sm:$0xff]  }
  0x4a   :  { %v3669_v14 = vld [vmem:[#allocation2 + $0x4a4] ss:$16 sps:$4 sm:$0xff]   ;;  %v3667_v17 = vld [vmem:[#allocation2 + $0x4a0] ss:$16 sps:$4 sm:$0xff]  }
  0x4b   :  { %1482 = vmatpush2.bf16.msra.mxu0 %v3613_v38  ;;  %v3672_v15 = vld [vmem:[#allocation2 + $0x6a4] ss:$16 sps:$4 sm:$0xff]   ;;  %v3670_v18 = vld [vmem:[#allocation2 + $0x6a0] ss:$16 sps:$4 sm:$0xff]  }
  0x4c   :  { %1523 = vmatpush2.bf16.msra.mxu1 %v3614_v39  ;;  %1483 = vmatprep.subr.bf16.mxu0 %v3615_v40  ;;  %v3675_v19 = vld [vmem:[#allocation2 + $0x484] ss:$16 sps:$4 sm:$0xff]   ;;  %v3673_v21 = vld [vmem:[#allocation2 + $0x480] ss:$16 sps:$4 sm:$0xff]  }
  0x4d   :  { %1524 = vmatprep.subr.bf16.mxu1 %v3617_v41  ;;  %v3678_v20 = vld [vmem:[#allocation2 + $0x684] ss:$16 sps:$4 sm:$0xff]   ;;  %v3676_v22 = vld [vmem:[#allocation2 + $0x680] ss:$16 sps:$4 sm:$0xff]  }
  0x4e   :  { %v3681_v23 = vld [vmem:[#allocation2 + $0x464] ss:$16 sps:$4 sm:$0xff]   ;;  %v3679_v25 = vld [vmem:[#allocation2 + $0x460] ss:$16 sps:$4 sm:$0xff]  }
  0x4f   :  { %1484 = vmatpush2.bf16.msra.mxu0 %v3619_v42  ;;  %v3684_v24 = vld [vmem:[#allocation2 + $0x664] ss:$16 sps:$4 sm:$0xff]   ;;  %v3682_v26 = vld [vmem:[#allocation2 + $0x660] ss:$16 sps:$4 sm:$0xff]   ;;  %v3709_v42 = vld [vmem:[#allocation2 + $0xec] ss:$16 sps:$4 sm:$0xff]  }
  0x50   :  { %1525 = vmatpush2.bf16.msra.mxu1 %v3620_v43  ;;  %1485 = vmatprep.subr.bf16.mxu0 %v3621_v44  ;;  %v3687_v27 = vld [vmem:[#allocation2 + $0x444] ss:$16 sps:$4 sm:$0xff]   ;;  %v3685_v29 = vld [vmem:[#allocation2 + $0x440] ss:$16 sps:$4 sm:$0xff]   ;;  %v3706_v44 = vld [vmem:[%s4351_s0 + $0x18] ss:$0 sps:$4 sm:$0xff]  }
  0x51   :  { %1526 = vmatprep.subr.bf16.mxu1 %v3623_v45  ;;  %v3690_v28 = vld [vmem:[#allocation2 + $0x644] ss:$16 sps:$4 sm:$0xff]   ;;  %v3688_v30 = vld [vmem:[#allocation2 + $0x640] ss:$16 sps:$4 sm:$0xff]   ;;  %v3707_v45 = vld [vmem:[#allocation2 + $0xe8] ss:$16 sps:$4 sm:$0xff]  }
  0x52   :  { %v3693_v31 = vld [vmem:[#allocation2 + $0x424] ss:$16 sps:$4 sm:$0xff]   ;;  %v3691_v34 = vld [vmem:[#allocation2 + $0x420] ss:$16 sps:$4 sm:$0xff]  }
  0x53   :  { %1486 = vmatpush2.bf16.msra.mxu0 %v3625_v49  ;;  %v3696_v32 = vld [vmem:[#allocation2 + $0x624] ss:$16 sps:$4 sm:$0xff]   ;;  %v3694_v36 = vld [vmem:[#allocation2 + $0x620] ss:$16 sps:$4 sm:$0xff]  }
  0x54   :  { %1527 = vmatpush2.bf16.msra.mxu1 %v3626_v50  ;;  %1487 = vmatprep.subr.bf16.mxu0 %v3627_v52  ;;  %v4266_v33 = vld [vmem:[%s4351_s0 + $0x10] sm:$0xff]  ;;  %v3713_v50 = vld [vmem:[#allocation2 + $0xc8] ss:$16 sps:$4 sm:$0xff]  }
  0x55   :  { %1528 = vmatprep.subr.bf16.mxu1 %v3629_v53  ;;  %v4270_v35 = vcombine.high %v4266_v33, %v4266_v33  ;;  %v3699_v37 = vld [vmem:[#allocation2 + $0x404] ss:$16 sps:$4 sm:$0xff]   ;;  %v3697_v39 = vld [vmem:[#allocation2 + $0x400] ss:$16 sps:$4 sm:$0xff]   ;;  %v3721_v53 = vld [vmem:[#allocation2 + $0xac] ss:$16 sps:$4 sm:$0xff]  }
  0x56   :  { %v3702_v38 = vld [vmem:[#allocation2 + $0x604] ss:$16 sps:$4 sm:$0xff]   ;;  %v3700_v40 = vld [vmem:[#allocation2 + $0x600] ss:$16 sps:$4 sm:$0xff]  }
  0x57   :  { %1488 = vmatpush2.bf16.msra.mxu0 %v3631_v54  ;;  %v3705_v41 = vld [vmem:[#allocation2 + $0x5e4] ss:$16 sps:$4 sm:$0xff]   ;;  %v3703_v43 = vld [vmem:[#allocation2 + $0x5e0] ss:$16 sps:$4 sm:$0xff]  }
  0x58   :  { %1529 = vmatpush2.bf16.msra.mxu1 %v3632_v55  ;;  %1489 = vmatprep.subr.bf16.mxu0 %v3633_v56  ;;  %v3712_v46 = vld [vmem:[#allocation2 + $0x5c4] ss:$16 sps:$4 sm:$0xff]   ;;  %v3710_v49 = vld [vmem:[#allocation2 + $0x5c0] ss:$16 sps:$4 sm:$0xff]   ;;  %v3719_v55 = vld [vmem:[#allocation2 + $0xa8] ss:$16 sps:$4 sm:$0xff]  }
  0x59   :  { %1530 = vmatprep.subr.bf16.mxu1 %v3635_v57  ;;  %v3718_v52 = vld [vmem:[#allocation2 + $0x5a4] ss:$16 sps:$4 sm:$0xff]   ;;  %v3716_v54 = vld [vmem:[#allocation2 + $0x5a0] ss:$16 sps:$4 sm:$0xff]   ;;  %v3727_v57 = vld [vmem:[#allocation2 + $0x8c] ss:$16 sps:$4 sm:$0xff]  }
  0x5a   :  { %v3724_v56 = vld [vmem:[#allocation2 + $0x584] ss:$16 sps:$4 sm:$0xff]  }
  0x5b   :  { %1490 = vmatpush2.bf16.msra.mxu0 %v3637_v58  ;;  %v3722_v58 = vld [vmem:[#allocation2 + $0x580] ss:$16 sps:$4 sm:$0xff]  }
  0x5c   :  { %1531 = vmatpush2.bf16.msra.mxu1 %v3638_v59  ;;  %1491 = vmatprep.subr.bf16.mxu0 %v3639_v60  ;;  %v3725_v59 = vld [vmem:[#allocation2 + $0x88] ss:$16 sps:$4 sm:$0xff]   ;;  %v3730_v60 = vld [vmem:[#allocation2 + $0x564] ss:$16 sps:$4 sm:$0xff]  }
  0x5d   :  { %1532 = vmatprep.subr.bf16.mxu1 %v3641_v61  ;;  %v3733_v61 = vld [vmem:[#allocation2 + $0x6c] ss:$16 sps:$4 sm:$0xff]  }
  0x5f   :  { %1492 = vmatpush2.bf16.msra.mxu0 %v3643_v62  ;;  %v3728_v62 = vld [vmem:[#allocation2 + $0x560] ss:$16 sps:$4 sm:$0xff]  }
  0x60   :  { %1533 = vmatpush2.bf16.msra.mxu1 %v3644_v63  ;;  %1493 = vmatprep.subr.bf16.mxu0 %v3645_v0  ;;  %v3736_v63 = vld [vmem:[#allocation2 + $0x544] ss:$16 sps:$4 sm:$0xff]   ;;  %v3739_v0 = vld [vmem:[#allocation2 + $0x4c] ss:$16 sps:$4 sm:$0xff]  }
  0x61   :  { %1534 = vmatprep.subr.bf16.mxu1 %v3647_v1  ;;  %v3734_v1 = vld [vmem:[#allocation2 + $0x540] ss:$16 sps:$4 sm:$0xff]  }
  0x63   :  { %1494 = vmatpush2.bf16.msra.mxu0 %v3649_v2  ;;  %v3737_v2 = vld [vmem:[#allocation2 + $0x48] ss:$16 sps:$4 sm:$0xff]  }
  0x64   :  { %1535 = vmatpush2.bf16.msra.mxu1 %v3650_v3  ;;  %1545 = vmatprep.subr.bf16.mxu0 %v3657_v4  ;;  %v3742_v3 = vld [vmem:[#allocation2 + $0x524] ss:$16 sps:$4 sm:$0xff]   ;;  %v3745_v4 = vld [vmem:[#allocation2 + $0x2c] ss:$16 sps:$4 sm:$0xff]  }
  0x65   :  { %1586 = vmatprep.subr.bf16.mxu1 %v3660_v5  ;;  %v3740_v5 = vld [vmem:[#allocation2 + $0x520] ss:$16 sps:$4 sm:$0xff]  }
  0x66   :  { %1496 = vmatmul.mubr.bf16.vlgmr.msra.gmra.mxu0 %v4256_v6 }
  0x67   :  { %1537 = vmatmul.mubr.bf16.vlgmr.msra.gmra.mxu1 %v4258_v7  ;;  %1546 = vmatpush1.bf16.msra.mxu0 %v3655_v8  ;;  %v3743_v8 = vld [vmem:[#allocation2 + $0x28] ss:$16 sps:$4 sm:$0xff]  }
  0x68   :  { %1587 = vmatpush1.bf16.msra.mxu1 %v3658_v9  ;;  %1547 = vmatprep.subr.bf16.mxu0 %v3663_v10  ;;  %v3748_v9 = vld [vmem:[#allocation2 + $0x504] ss:$16 sps:$4 sm:$0xff]   ;;  %v3751_v10 = vld [vmem:[#allocation2 + $0xc] ss:$16 sps:$4 sm:$0xff]  }
  0x69   :  { %1588 = vmatprep.subr.bf16.mxu1 %v3666_v11  ;;  %1618 = vmatprep.mubr.bf16.mxu1 %v4194_v16  ;;  %v3746_v11 = vld [vmem:[#allocation2 + $0x500] ss:$16 sps:$4 sm:$0xff]  }
  0x6a   :  { %1577 = vmatprep.mubr.bf16.mxu0 %v4270_v35 }
  0x6b   :  { %1548 = vmatpush1.bf16.msra.mxu0 %v3661_v12  ;;  %v3749_v12 = vld [vmem:[#allocation2 + $0x8] ss:$16 sps:$4 sm:$0xff]  }
  0x6c   :  { %1589 = vmatpush1.bf16.msra.mxu1 %v3664_v13  ;;  %1549 = vmatprep.subr.bf16.mxu0 %v3669_v14  ;;  %v3756_v13 = vld [vmem:[#allocation2 + $0x1ec] ss:$16 sps:$4 sm:$0xff]  }
  0x6d   :  { %1590 = vmatprep.subr.bf16.mxu1 %v3672_v15  ;;  %v3759_v14 = vld [vmem:[#allocation2 + $0x2ec] ss:$16 sps:$4 sm:$0xff]   ;;  %v4279_v15 = vcombine.low %v4266_v33, %v4266_v33  ;;  %v3778_v33 = vld [vmem:[#allocation2 + $0x168] ss:$16 sps:$4 sm:$0xff]  }
  0x6f   :  { %1550 = vmatpush1.bf16.msra.mxu0 %v3667_v17  ;;  %v3754_v17 = vld [vmem:[#allocation2 + $0x1e8] ss:$16 sps:$4 sm:$0xff]  }
  0x70   :  { %1591 = vmatpush1.bf16.msra.mxu1 %v3670_v18  ;;  %1551 = vmatprep.subr.bf16.mxu0 %v3675_v19  ;;  %v3757_v18 = vld [vmem:[#allocation2 + $0x2e8] ss:$16 sps:$4 sm:$0xff]   ;;  %v3762_v19 = vld [vmem:[#allocation2 + $0x1cc] ss:$16 sps:$4 sm:$0xff]  }
  0x71   :  { %1592 = vmatprep.subr.bf16.mxu1 %v3678_v20  ;;  %v3765_v20 = vld [vmem:[#allocation2 + $0x2cc] ss:$16 sps:$4 sm:$0xff]  }
  0x73   :  { %1552 = vmatpush1.bf16.msra.mxu0 %v3673_v21  ;;  %v3760_v21 = vld [vmem:[#allocation2 + $0x1c8] ss:$16 sps:$4 sm:$0xff]  }
  0x74   :  { %1593 = vmatpush1.bf16.msra.mxu1 %v3676_v22  ;;  %1553 = vmatprep.subr.bf16.mxu0 %v3681_v23  ;;  %v3763_v22 = vld [vmem:[#allocation2 + $0x2c8] ss:$16 sps:$4 sm:$0xff]   ;;  %v3768_v23 = vld [vmem:[#allocation2 + $0x1ac] ss:$16 sps:$4 sm:$0xff]  }
  0x75   :  { %1594 = vmatprep.subr.bf16.mxu1 %v3684_v24  ;;  %v3771_v24 = vld [vmem:[#allocation2 + $0x2ac] ss:$16 sps:$4 sm:$0xff]  }
  0x77   :  { %1554 = vmatpush1.bf16.msra.mxu0 %v3679_v25  ;;  %v3766_v25 = vld [vmem:[#allocation2 + $0x1a8] ss:$16 sps:$4 sm:$0xff]  }
  0x78   :  { %1595 = vmatpush1.bf16.msra.mxu1 %v3682_v26  ;;  %1555 = vmatprep.subr.bf16.mxu0 %v3687_v27  ;;  %v3769_v26 = vld [vmem:[#allocation2 + $0x2a8] ss:$16 sps:$4 sm:$0xff]   ;;  %v3774_v27 = vld [vmem:[#allocation2 + $0x18c] ss:$16 sps:$4 sm:$0xff]  }
  0x79   :  { %1596 = vmatprep.subr.bf16.mxu1 %v3690_v28  ;;  %v3777_v28 = vld [vmem:[#allocation2 + $0x28c] ss:$16 sps:$4 sm:$0xff]  }
  0x7b   :  { %1556 = vmatpush1.bf16.msra.mxu0 %v3685_v29  ;;  %v3772_v29 = vld [vmem:[#allocation2 + $0x188] ss:$16 sps:$4 sm:$0xff]  }
  0x7c   :  { %1597 = vmatpush1.bf16.msra.mxu1 %v3688_v30  ;;  %1557 = vmatprep.subr.bf16.mxu0 %v3693_v31  ;;  %v3775_v30 = vld [vmem:[#allocation2 + $0x288] ss:$16 sps:$4 sm:$0xff]   ;;  %v3780_v31 = vld [vmem:[#allocation2 + $0x16c] ss:$16 sps:$4 sm:$0xff]  }
  0x7d   :  { %1598 = vmatprep.subr.bf16.mxu1 %v3696_v32  ;;  %v3783_v32 = vld [vmem:[#allocation2 + $0x26c] ss:$16 sps:$4 sm:$0xff]  }
  0x7f   :  { %1558 = vmatpush1.bf16.msra.mxu0 %v3691_v34  ;;  %v3786_v34 = vld [vmem:[#allocation2 + $0x14c] ss:$16 sps:$4 sm:$0xff]  }
  0x80   :  { %1599 = vmatpush1.bf16.msra.mxu1 %v3694_v36  ;;  %1559 = vmatprep.subr.bf16.mxu0 %v3699_v37  ;;  %v3789_v36 = vld [vmem:[#allocation2 + $0x24c] ss:$16 sps:$4 sm:$0xff]   ;;  %v3784_v37 = vld [vmem:[#allocation2 + $0x148] ss:$16 sps:$4 sm:$0xff]  }
  0x81   :  { %1600 = vmatprep.subr.bf16.mxu1 %v3702_v38  ;;  %v3787_v38 = vld [vmem:[#allocation2 + $0x248] ss:$16 sps:$4 sm:$0xff]  }
  0x83   :  { %1560 = vmatpush1.bf16.msra.mxu0 %v3697_v39  ;;  %v3792_v39 = vld [vmem:[#allocation2 + $0x12c] ss:$16 sps:$4 sm:$0xff]  }
  0x84   :  { %1601 = vmatpush1.bf16.msra.mxu1 %v3700_v40  ;;  %1561 = vmatprep.subr.bf16.mxu0 %v3705_v41  ;;  %v3795_v40 = vld [vmem:[#allocation2 + $0x22c] ss:$16 sps:$4 sm:$0xff]   ;;  %v3790_v41 = vld [vmem:[#allocation2 + $0x128] ss:$16 sps:$4 sm:$0xff]  }
  0x85   :  { %1627 = vmatprep.subr.bf16.mxu1 %v3709_v42  ;;  %v3793_v42 = vld [vmem:[#allocation2 + $0x228] ss:$16 sps:$4 sm:$0xff]  }
  0x87   :  { %1619 = vmatmul.mubr.bf16.vlgmr.msra.gmra.mxu1 %v3706_v44  ;;  %1562 = vmatpush2.bf16.msra.mxu0 %v3703_v43  ;;  %v3798_v43 = vld [vmem:[#allocation2 + $0x10c] ss:$16 sps:$4 sm:$0xff]  }
  0x88   :  { %1628 = vmatpush1.bf16.msra.mxu1 %v3707_v45  ;;  %1563 = vmatprep.subr.bf16.mxu0 %v3712_v46  ;;  %v3801_v44 = vld [vmem:[#allocation2 + $0x20c] ss:$16 sps:$4 sm:$0xff]   ;;  %v3796_v45 = vld [vmem:[#allocation2 + $0x108] ss:$16 sps:$4 sm:$0xff]  }
  0x89   :  { %1629 = vmatprep.subr.bf16.mxu1 %v3715_v48  ;;  %1659 = vmatprep.mubr.bf16.mxu1 %v4247_v47  ;;  %v3731_v47 = vld [vmem:[#allocation2 + $0x68] ss:$16 sps:$4 sm:$0xff]   ;;  %v3804_v48 = vld [vmem:[#allocation2 + $0x3ec] ss:$16 sps:$4 sm:$0xff]  }
  0x8a   :  { %v3799_v46 = vld [vmem:[#allocation2 + $0x208] ss:$16 sps:$4 sm:$0xff]  }
  0x8b   :  { %1564 = vmatpush2.bf16.msra.mxu0 %v3710_v49  ;;  %v3807_v49 = vld [vmem:[#allocation2 + $0x4ec] ss:$16 sps:$4 sm:$0xff]  }
  0x8c   :  { %1630 = vmatpush1.bf16.msra.mxu1 %v3713_v50  ;;  %1565 = vmatprep.subr.bf16.mxu0 %v3718_v52  ;;  %v3802_v50 = vld [vmem:[#allocation2 + $0x3e8] ss:$16 sps:$4 sm:$0xff]  }
  0x8d   :  { %1631 = vmatprep.subr.bf16.mxu1 %v3721_v53  ;;  %v3805_v52 = vld [vmem:[#allocation2 + $0x4e8] ss:$16 sps:$4 sm:$0xff]   ;;  %v3810_v53 = vld [vmem:[#allocation2 + $0x3cc] ss:$16 sps:$4 sm:$0xff]  }
  0x8f   :  { %1566 = vmatpush2.bf16.msra.mxu0 %v3716_v54  ;;  %v3813_v54 = vld [vmem:[#allocation2 + $0x4cc] ss:$16 sps:$4 sm:$0xff]  }
  0x90   :  { %1632 = vmatpush1.bf16.msra.mxu1 %v3719_v55  ;;  %1567 = vmatprep.subr.bf16.mxu0 %v3724_v56  ;;  %v3808_v55 = vld [vmem:[#allocation2 + $0x3c8] ss:$16 sps:$4 sm:$0xff]  }
  0x91   :  { %1633 = vmatprep.subr.bf16.mxu1 %v3727_v57  ;;  %v3811_v56 = vld [vmem:[#allocation2 + $0x4c8] ss:$16 sps:$4 sm:$0xff]   ;;  %v3816_v57 = vld [vmem:[#allocation2 + $0x3ac] ss:$16 sps:$4 sm:$0xff]  }
  0x93   :  { %1568 = vmatpush2.bf16.msra.mxu0 %v3722_v58  ;;  %v3819_v58 = vld [vmem:[#allocation2 + $0x4ac] ss:$16 sps:$4 sm:$0xff]  }
  0x94   :  { %1634 = vmatpush1.bf16.msra.mxu1 %v3725_v59  ;;  %1569 = vmatprep.subr.bf16.mxu0 %v3730_v60  ;;  %v3814_v59 = vld [vmem:[#allocation2 + $0x3a8] ss:$16 sps:$4 sm:$0xff]  }
  0x95   :  { %1635 = vmatprep.subr.bf16.mxu1 %v3733_v61  ;;  %v3817_v60 = vld [vmem:[#allocation2 + $0x4a8] ss:$16 sps:$4 sm:$0xff]   ;;  %v3822_v61 = vld [vmem:[#allocation2 + $0x38c] ss:$16 sps:$4 sm:$0xff]  }
  0x97   :  { %1570 = vmatpush2.bf16.msra.mxu0 %v3728_v62  ;;  %v3825_v62 = vld [vmem:[#allocation2 + $0x48c] ss:$16 sps:$4 sm:$0xff]  }
  0x98   :  { %1636 = vmatpush1.bf16.msra.mxu1 %v3731_v47  ;;  %1571 = vmatprep.subr.bf16.mxu0 %v3736_v63  ;;  %v3820_v47 = vld [vmem:[#allocation2 + $0x388] ss:$16 sps:$4 sm:$0xff]   ;;  %v3828_v63 = vld [vmem:[#allocation2 + $0x36c] ss:$16 sps:$4 sm:$0xff]  }
  0x99   :  { %1637 = vmatprep.subr.bf16.mxu1 %v3739_v0  ;;  %v3831_v0 = vld [vmem:[#allocation2 + $0x46c] ss:$16 sps:$4 sm:$0xff]  }
  0x9b   :  { %1572 = vmatpush2.bf16.msra.mxu0 %v3734_v1  ;;  %v3826_v1 = vld [vmem:[#allocation2 + $0x368] ss:$16 sps:$4 sm:$0xff]  }
  0x9c   :  { %1638 = vmatpush1.bf16.msra.mxu1 %v3737_v2  ;;  %1573 = vmatprep.subr.bf16.mxu0 %v3742_v3  ;;  %v3829_v2 = vld [vmem:[#allocation2 + $0x468] ss:$16 sps:$4 sm:$0xff]   ;;  %v3834_v3 = vld [vmem:[#allocation2 + $0x34c] ss:$16 sps:$4 sm:$0xff]  }
  0x9d   :  { %1639 = vmatprep.subr.bf16.mxu1 %v3745_v4  ;;  %v3837_v4 = vld [vmem:[#allocation2 + $0x44c] ss:$16 sps:$4 sm:$0xff]  }
  0x9f   :  { %1574 = vmatpush2.bf16.msra.mxu0 %v3740_v5  ;;  %v3835_v5 = vld [vmem:[#allocation2 + $0x448] ss:$16 sps:$4 sm:$0xff]  }
  0xa0   :  { %1640 = vmatpush1.bf16.msra.mxu1 %v3743_v8  ;;  %1575 = vmatprep.subr.bf16.mxu0 %v3748_v9  ;;  %v3840_v8 = vld [vmem:[#allocation2 + $0x32c] ss:$16 sps:$4 sm:$0xff]  }
  0xa1   :  { %1641 = vmatprep.subr.bf16.mxu1 %v3751_v10  ;;  %v3843_v9 = vld [vmem:[#allocation2 + $0x42c] ss:$16 sps:$4 sm:$0xff]   ;;  %v3838_v10 = vld [vmem:[#allocation2 + $0x328] ss:$16 sps:$4 sm:$0xff]  }
  0xa3   :  { %1576 = vmatpush2.bf16.msra.mxu0 %v3746_v11  ;;  %v3841_v11 = vld [vmem:[#allocation2 + $0x428] ss:$16 sps:$4 sm:$0xff]  }
  0xa4   :  { %1642 = vmatpush1.bf16.msra.mxu1 %v3749_v12  ;;  %1668 = vmatprep.subr.bf16.mxu0 %v3759_v14  ;;  %v3846_v12 = vld [vmem:[#allocation2 + $0x30c] ss:$16 sps:$4 sm:$0xff]   ;;  %v3844_v14 = vld [vmem:[#allocation2 + $0x308] ss:$16 sps:$4 sm:$0xff]  }
  0xa5   :  { %1643 = vmatprep.subr.bf16.mxu1 %v3756_v13  ;;  %v3849_v13 = vld [vmem:[#allocation2 + $0x40c] ss:$16 sps:$4 sm:$0xff]  }
  0xa6   :  { %1578 = vmatmul.mubr.bf16.vlgmr.msra.gmra.mxu0 %v4279_v15 }
  0xa7   :  { %1669 = vmatpush1.bf16.msra.mxu0 %v3757_v18  ;;  %1700 = vmatprep.mubr.bf16.mxu0 %v4252_v51  ;;  %v3781_v51 = vld [vmem:[#allocation2 + $0x268] ss:$16 sps:$4 sm:$0xff]   ;;  %v3852_v18 = vld [vmem:[#allocation2 + $0x5ec] ss:$16 sps:$4 sm:$0xff]  }
  0xa8   :  { %1644 = vmatpush2.bf16.msra.mxu1 %v3754_v17  ;;  %1670 = vmatprep.subr.bf16.mxu0 %v3765_v20  ;;  %v3847_v17 = vld [vmem:[#allocation2 + $0x408] ss:$16 sps:$4 sm:$0xff]  }
  0xa9   :  { %1645 = vmatprep.subr.bf16.mxu1 %v3762_v19  ;;  %v3855_v19 = vld [vmem:[#allocation2 + $0x6ec] ss:$16 sps:$4 sm:$0xff]   ;;  %v3850_v20 = vld [vmem:[#allocation2 + $0x5e8] ss:$16 sps:$4 sm:$0xff]  }
  0xab   :  { %1671 = vmatpush1.bf16.msra.mxu0 %v3763_v22  ;;  %v3858_v22 = vld [vmem:[#allocation2 + $0x5cc] ss:$16 sps:$4 sm:$0xff]  }
  0xac   :  { %1646 = vmatpush2.bf16.msra.mxu1 %v3760_v21  ;;  %1672 = vmatprep.subr.bf16.mxu0 %v3771_v24  ;;  %v3853_v21 = vld [vmem:[#allocation2 + $0x6e8] ss:$16 sps:$4 sm:$0xff]  }
  0xad   :  { %1647 = vmatprep.subr.bf16.mxu1 %v3768_v23  ;;  %v3861_v23 = vld [vmem:[#allocation2 + $0x6cc] ss:$16 sps:$4 sm:$0xff]   ;;  %v3856_v24 = vld [vmem:[#allocation2 + $0x5c8] ss:$16 sps:$4 sm:$0xff]  }
  0xaf   :  { %1673 = vmatpush1.bf16.msra.mxu0 %v3769_v26  ;;  %v3864_v26 = vld [vmem:[#allocation2 + $0x5ac] ss:$16 sps:$4 sm:$0xff]  }
  0xb0   :  { %1648 = vmatpush2.bf16.msra.mxu1 %v3766_v25  ;;  %1674 = vmatprep.subr.bf16.mxu0 %v3777_v28  ;;  %v3859_v25 = vld [vmem:[#allocation2 + $0x6c8] ss:$16 sps:$4 sm:$0xff]  }
  0xb1   :  { %1649 = vmatprep.subr.bf16.mxu1 %v3774_v27  ;;  %v3867_v27 = vld [vmem:[#allocation2 + $0x6ac] ss:$16 sps:$4 sm:$0xff]   ;;  %v3862_v28 = vld [vmem:[#allocation2 + $0x5a8] ss:$16 sps:$4 sm:$0xff]  }
  0xb3   :  { %1675 = vmatpush1.bf16.msra.mxu0 %v3775_v30  ;;  %v3870_v30 = vld [vmem:[#allocation2 + $0x58c] ss:$16 sps:$4 sm:$0xff]  }
  0xb4   :  { %1650 = vmatpush2.bf16.msra.mxu1 %v3772_v29  ;;  %1676 = vmatprep.subr.bf16.mxu0 %v3783_v32  ;;  %v3865_v29 = vld [vmem:[#allocation2 + $0x6a8] ss:$16 sps:$4 sm:$0xff]  }
  0xb5   :  { %1651 = vmatprep.subr.bf16.mxu1 %v3780_v31  ;;  %v3873_v31 = vld [vmem:[#allocation2 + $0x68c] ss:$16 sps:$4 sm:$0xff]   ;;  %v3868_v32 = vld [vmem:[#allocation2 + $0x588] ss:$16 sps:$4 sm:$0xff]  }
  0xb7   :  { %1677 = vmatpush1.bf16.msra.mxu0 %v3781_v51  ;;  %v3879_v51 = vld [vmem:[#allocation2 + $0x66c] ss:$16 sps:$4 sm:$0xff]  }
  0xb8   :  { %1652 = vmatpush2.bf16.msra.mxu1 %v3778_v33  ;;  %1678 = vmatprep.subr.bf16.mxu0 %v3789_v36  ;;  %v3871_v33 = vld [vmem:[#allocation2 + $0x688] ss:$16 sps:$4 sm:$0xff]  }
  0xb9   :  { %1653 = vmatprep.subr.bf16.mxu1 %v3786_v34  ;;  %v3874_v34 = vld [vmem:[#allocation2 + $0x568] ss:$16 sps:$4 sm:$0xff]  }
  0xba   :  { %v3877_v36 = vld [vmem:[#allocation2 + $0x668] ss:$16 sps:$4 sm:$0xff]  }
  0xbb   :  { %1679 = vmatpush1.bf16.msra.mxu0 %v3787_v38  ;;  %v3880_v38 = vld [vmem:[#allocation2 + $0x548] ss:$16 sps:$4 sm:$0xff]  }
  0xbc   :  { %1654 = vmatpush2.bf16.msra.mxu1 %v3784_v37  ;;  %1680 = vmatprep.subr.bf16.mxu0 %v3795_v40  ;;  %v3882_v37 = vld [vmem:[#allocation2 + $0x54c] ss:$16 sps:$4 sm:$0xff]  }
  0xbd   :  { %1655 = vmatprep.subr.bf16.mxu1 %v3792_v39  ;;  %v3883_v39 = vld [vmem:[#allocation2 + $0x648] ss:$16 sps:$4 sm:$0xff]   ;;  %v3888_v40 = vld [vmem:[#allocation2 + $0x52c] ss:$16 sps:$4 sm:$0xff]  }
  0xbf   :  { %1681 = vmatpush1.bf16.msra.mxu0 %v3793_v42  ;;  %v3886_v42 = vld [vmem:[#allocation2 + $0x528] ss:$16 sps:$4 sm:$0xff]  }
  0xc0   :  { %1656 = vmatpush2.bf16.msra.mxu1 %v3790_v41  ;;  %1682 = vmatprep.subr.bf16.mxu0 %v3801_v44  ;;  %v3891_v41 = vld [vmem:[#allocation2 + $0x62c] ss:$16 sps:$4 sm:$0xff]  }
  0xc1   :  { %1657 = vmatprep.subr.bf16.mxu1 %v3798_v43  ;;  %v3889_v43 = vld [vmem:[#allocation2 + $0x628] ss:$16 sps:$4 sm:$0xff]   ;;  %v3894_v44 = vld [vmem:[#allocation2 + $0x50c] ss:$16 sps:$4 sm:$0xff]  }
  0xc3   :  { %1683 = vmatpush1.bf16.msra.mxu0 %v3799_v46  ;;  %v3892_v46 = vld [vmem:[#allocation2 + $0x508] ss:$16 sps:$4 sm:$0xff]  }
  0xc4   :  { %1658 = vmatpush2.bf16.msra.mxu1 %v3796_v45  ;;  %1684 = vmatprep.subr.bf16.mxu0 %v3804_v48  ;;  %v3897_v45 = vld [vmem:[#allocation2 + $0x60c] ss:$16 sps:$4 sm:$0xff]   ;;  %v3895_v48 = vld [vmem:[#allocation2 + $0x608] ss:$16 sps:$4 sm:$0xff]  }
  0xc5   :  { %1709 = vmatprep.subr.bf16.mxu1 %v3807_v49  ;;  %v3900_v49 = vld [vmem:[#allocation4 + $0xe4] ss:$16 sps:$4 sm:$0xff]  }
  0xc7   :  { %1660 = vmatmul.mubr.bf16.vlgmr.msra.gmra.mxu1 %v4256_v6  ;;  %1685 = vmatpush2.bf16.msra.mxu0 %v3802_v50  ;;  %v3823_v6 = vld [vmem:[#allocation2 + $0x488] ss:$16 sps:$4 sm:$0xff]   ;;  %v3898_v50 = vld [vmem:[#allocation4 + $0xe0] ss:$16 sps:$4 sm:$0xff]  }
  0xc8   :  { %1710 = vmatpush1.bf16.msra.mxu1 %v3805_v52  ;;  %1686 = vmatprep.subr.bf16.mxu0 %v3810_v53  ;;  %v3903_v52 = vld [vmem:[#allocation4 + $0xc4] ss:$16 sps:$4 sm:$0xff]   ;;  %v4122_v53 = vld [vmem:[%s4351_s0 + $0x18] ss:$0 sps:$4 sm:$0xff]  }
  0xc9   :  { %1711 = vmatprep.subr.bf16.mxu1 %v3813_v54  ;;  %1741 = vmatprep.mubr.bf16.mxu1 %v4270_v35  ;;  %v3832_v35 = vld [vmem:[#allocation2 + $0x348] ss:$16 sps:$4 sm:$0xff]   ;;  %v3901_v54 = vld [vmem:[#allocation4 + $0xc0] ss:$16 sps:$4 sm:$0xff]  }
  0xcb   :  { %1687 = vmatpush2.bf16.msra.mxu0 %v3808_v55  ;;  %v3906_v55 = vld [vmem:[#allocation4 + $0xa4] ss:$16 sps:$4 sm:$0xff]  }
  0xcc   :  { %1712 = vmatpush1.bf16.msra.mxu1 %v3811_v56  ;;  %1688 = vmatprep.subr.bf16.mxu0 %v3816_v57  ;;  %v3904_v56 = vld [vmem:[#allocation4 + $0xa0] ss:$16 sps:$4 sm:$0xff]   ;;  %v3909_v57 = vld [vmem:[#allocation4 + $0x84] ss:$16 sps:$4 sm:$0xff]  }
  0xcd   :  { %1713 = vmatprep.subr.bf16.mxu1 %v3819_v58  ;;  %v3907_v58 = vld [vmem:[#allocation4 + $0x80] ss:$16 sps:$4 sm:$0xff]  }
  0xcf   :  { %1689 = vmatpush2.bf16.msra.mxu0 %v3814_v59  ;;  %v3970_v59 = vld [vmem:[#allocation4 + $0x2e0] ss:$16 sps:$4 sm:$0xff]  }
  0xd0   :  { %1714 = vmatpush1.bf16.msra.mxu1 %v3817_v60  ;;  %1690 = vmatprep.subr.bf16.mxu0 %v3822_v61  ;;  %v3972_v60 = vld [vmem:[#allocation4 + $0x2e4] ss:$16 sps:$4 sm:$0xff]  }
  0xd1   :  { %1715 = vmatprep.subr.bf16.mxu1 %v3825_v62  ;;  %v3912_v61 = vld [vmem:[#allocation4 + $0x64] ss:$16 sps:$4 sm:$0xff]   ;;  %v3976_v62 = vld [vmem:[#allocation4 + $0x2c0] ss:$16 sps:$4 sm:$0xff]  }
  0xd3   :  { %1691 = vmatpush2.bf16.msra.mxu0 %v3820_v47  ;;  %v3978_v47 = vld [vmem:[#allocation4 + $0x2c4] ss:$16 sps:$4 sm:$0xff]  }
  0xd4   :  { %1716 = vmatpush1.bf16.msra.mxu1 %v3823_v6  ;;  %1692 = vmatprep.subr.bf16.mxu0 %v3828_v63  ;;  %v3915_v6 = vld [vmem:[#allocation4 + $0x44] ss:$16 sps:$4 sm:$0xff]   ;;  %v3913_v63 = vld [vmem:[#allocation4 + $0x40] ss:$16 sps:$4 sm:$0xff]  }
  0xd5   :  { %1717 = vmatprep.subr.bf16.mxu1 %v3831_v0  ;;  %v3982_v0 = vld [vmem:[#allocation4 + $0x2a0] ss:$16 sps:$4 sm:$0xff]  }
  0xd7   :  { %1693 = vmatpush2.bf16.msra.mxu0 %v3826_v1  ;;  %v3984_v1 = vld [vmem:[#allocation4 + $0x2a4] ss:$16 sps:$4 sm:$0xff]  }
  0xd8   :  { %1718 = vmatpush1.bf16.msra.mxu1 %v3829_v2  ;;  %1694 = vmatprep.subr.bf16.mxu0 %v3834_v3  ;;  %v3918_v2 = vld [vmem:[#allocation4 + $0x24] ss:$16 sps:$4 sm:$0xff]   ;;  %v3916_v3 = vld [vmem:[#allocation4 + $0x20] ss:$16 sps:$4 sm:$0xff]  }
  0xd9   :  { %1719 = vmatprep.subr.bf16.mxu1 %v3837_v4  ;;  %v3988_v4 = vld [vmem:[#allocation4 + $0x280] ss:$16 sps:$4 sm:$0xff]  }
  0xdb   :  { %1695 = vmatpush2.bf16.msra.mxu0 %v3832_v35  ;;  %v3990_v35 = vld [vmem:[#allocation4 + $0x284] ss:$16 sps:$4 sm:$0xff]  }
  0xdc   :  { %1720 = vmatpush1.bf16.msra.mxu1 %v3835_v5  ;;  %1696 = vmatprep.subr.bf16.mxu0 %v3840_v8  ;;  %v3921_v5 = vld [vmem:[#allocation4 + $0x4] ss:$16 sps:$4 sm:$0xff]   ;;  %v3919_v8 = vld [vmem:[#allocation4] ss:$16 sps:$4 sm:$0xff]  }
  0xdd   :  { %1721 = vmatprep.subr.bf16.mxu1 %v3843_v9  ;;  %v3994_v9 = vld [vmem:[#allocation4 + $0x260] ss:$16 sps:$4 sm:$0xff]  }
  0xdf   :  { %1697 = vmatpush2.bf16.msra.mxu0 %v3838_v10  ;;  %v3996_v10 = vld [vmem:[#allocation4 + $0x264] ss:$16 sps:$4 sm:$0xff]  }
  0xe0   :  { %1722 = vmatpush1.bf16.msra.mxu1 %v3841_v11  ;;  %1698 = vmatprep.subr.bf16.mxu0 %v3846_v12  ;;  %v3924_v11 = vld [vmem:[#allocation4 + $0x1e4] ss:$16 sps:$4 sm:$0xff]   ;;  %v3922_v12 = vld [vmem:[#allocation4 + $0x1e0] ss:$16 sps:$4 sm:$0xff]  }
  0xe1   :  { %1723 = vmatprep.subr.bf16.mxu1 %v3849_v13  ;;  %v4000_v13 = vld [vmem:[#allocation4 + $0x240] ss:$16 sps:$4 sm:$0xff]  }
  0xe3   :  { %1699 = vmatpush2.bf16.msra.mxu0 %v3844_v14  ;;  %v4002_v14 = vld [vmem:[#allocation4 + $0x244] ss:$16 sps:$4 sm:$0xff]  }
  0xe4   :  { %1724 = vmatpush1.bf16.msra.mxu1 %v3847_v17  ;;  %1750 = vmatprep.subr.bf16.mxu0 %v3855_v19  ;;  %v3927_v17 = vld [vmem:[#allocation4 + $0x1c4] ss:$16 sps:$4 sm:$0xff]  }
  0xe5   :  { %1725 = vmatprep.subr.bf16.mxu1 %v3852_v18 }
  0xe6   :  { %1701 = vmatmul.mubr.bf16.vlgmr.msra.gmra.mxu0 %v4258_v7  ;;  %v3876_v7 = vld [vmem:[#allocation2 + $0x56c] ss:$16 sps:$4 sm:$0xff]  }
  0xe7   :  { %1751 = vmatpush1.bf16.msra.mxu0 %v3853_v21  ;;  %1782 = vmatprep.mubr.bf16.mxu0 %v4194_v16  ;;  %v3885_v16 = vld [vmem:[#allocation2 + $0x64c] ss:$16 sps:$4 sm:$0xff]  }
  0xe8   :  { %1726 = vmatpush2.bf16.msra.mxu1 %v3850_v20  ;;  %1752 = vmatprep.subr.bf16.mxu0 %v3861_v23  ;;  %v3925_v20 = vld [vmem:[#allocation4 + $0x1c0] ss:$16 sps:$4 sm:$0xff]   ;;  %v3930_v23 = vld [vmem:[#allocation4 + $0x1a4] ss:$16 sps:$4 sm:$0xff]  }
  0xe9   :  { %1727 = vmatprep.subr.bf16.mxu1 %v3858_v22 }
  0xeb   :  { %1753 = vmatpush1.bf16.msra.mxu0 %v3859_v25  ;;  %v4006_v25 = vld [vmem:[#allocation4 + $0x220] ss:$16 sps:$4 sm:$0xff]  }
  0xec   :  { %1728 = vmatpush2.bf16.msra.mxu1 %v3856_v24  ;;  %1754 = vmatprep.subr.bf16.mxu0 %v3867_v27  ;;  %v4008_v24 = vld [vmem:[#allocation4 + $0x224] ss:$16 sps:$4 sm:$0xff]  }
  0xed   :  { %1729 = vmatprep.subr.bf16.mxu1 %v3864_v26 }
  0xef   :  { %1755 = vmatpush1.bf16.msra.mxu0 %v3865_v29 }
  0xf0   :  { %1730 = vmatpush2.bf16.msra.mxu1 %v3862_v28  ;;  %1756 = vmatprep.subr.bf16.mxu0 %v3873_v31  ;;  %v3928_v28 = vld [vmem:[#allocation4 + $0x1a0] ss:$16 sps:$4 sm:$0xff]   ;;  %v3933_v31 = vld [vmem:[#allocation4 + $0x184] ss:$16 sps:$4 sm:$0xff]  }
  0xf1   :  { %1731 = vmatprep.subr.bf16.mxu1 %v3870_v30 }
  0xf3   :  { %1757 = vmatpush1.bf16.msra.mxu0 %v3871_v33  ;;  %v4014_v33 = vld [vmem:[#allocation4 + $0x204] ss:$16 sps:$4 sm:$0xff]  }
  0xf4   :  { %1732 = vmatpush2.bf16.msra.mxu1 %v3868_v32  ;;  %1758 = vmatprep.subr.bf16.mxu0 %v3879_v51  ;;  %v4012_v32 = vld [vmem:[#allocation4 + $0x200] ss:$16 sps:$4 sm:$0xff]  }
  0xf5   :  { %1733 = vmatprep.subr.bf16.mxu1 %v3876_v7  ;;  %v3931_v7 = vld [vmem:[#allocation4 + $0x180] ss:$16 sps:$4 sm:$0xff]  }
  0xf6   :  { %v4018_v51 = vld [vmem:[#allocation4 + $0x3e0] ss:$16 sps:$4 sm:$0xff]  }
  0xf7   :  { %1759 = vmatpush1.bf16.msra.mxu0 %v3877_v36  ;;  %v3936_v36 = vld [vmem:[#allocation4 + $0x164] ss:$16 sps:$4 sm:$0xff]  }
  0xf8   :  { %1734 = vmatpush2.bf16.msra.mxu1 %v3874_v34  ;;  %1760 = vmatprep.subr.bf16.mxu0 %v3885_v16  ;;  %v4020_v34 = vld [vmem:[#allocation4 + $0x3e4] ss:$16 sps:$4 sm:$0xff]   ;;  %v3934_v16 = vld [vmem:[#allocation4 + $0x160] ss:$16 sps:$4 sm:$0xff]  }
  0xf9   :  { %1735 = vmatprep.subr.bf16.mxu1 %v3882_v37  ;;  %v4023_v37 = vld [vmem:[#allocation4 + $0x3c4] ss:$16 sps:$4 sm:$0xff]  }
  0xfb   :  { %1761 = vmatpush1.bf16.msra.mxu0 %v3883_v39  ;;  %v3939_v39 = vld [vmem:[#allocation4 + $0x144] ss:$16 sps:$4 sm:$0xff]  }
  0xfc   :  { %1736 = vmatpush2.bf16.msra.mxu1 %v3880_v38  ;;  %1762 = vmatprep.subr.bf16.mxu0 %v3891_v41  ;;  %v4021_v38 = vld [vmem:[#allocation4 + $0x3c0] ss:$16 sps:$4 sm:$0xff]  }
  0xfd   :  { %1737 = vmatprep.subr.bf16.mxu1 %v3888_v40  ;;  %v4026_v40 = vld [vmem:[#allocation4 + $0x3a4] ss:$16 sps:$4 sm:$0xff]   ;;  %v3937_v41 = vld [vmem:[#allocation4 + $0x140] ss:$16 sps:$4 sm:$0xff]  }
  0xff   :  { %1763 = vmatpush1.bf16.msra.mxu0 %v3889_v43  ;;  %v3942_v43 = vld [vmem:[#allocation4 + $0x124] ss:$16 sps:$4 sm:$0xff]  }
 0x100   :  { %1738 = vmatpush2.bf16.msra.mxu1 %v3886_v42  ;;  %1764 = vmatprep.subr.bf16.mxu0 %v3897_v45  ;;  %v4024_v42 = vld [vmem:[#allocation4 + $0x3a0] ss:$16 sps:$4 sm:$0xff]  }
 0x101   :  { %1739 = vmatprep.subr.bf16.mxu1 %v3894_v44  ;;  %v4029_v44 = vld [vmem:[#allocation4 + $0x384] ss:$16 sps:$4 sm:$0xff]   ;;  %v3940_v45 = vld [vmem:[#allocation4 + $0x120] ss:$16 sps:$4 sm:$0xff]  }
 0x103   :  { %1765 = vmatpush1.bf16.msra.mxu0 %v3895_v48  ;;  %v3945_v48 = vld [vmem:[#allocation4 + $0x104] ss:$16 sps:$4 sm:$0xff]  }
 0x104   :  { %1740 = vmatpush2.bf16.msra.mxu1 %v3892_v46  ;;  %2589 = vmatprep.subr.bf16.mxu0 %v3900_v49  ;;  %v4027_v46 = vld [vmem:[#allocation4 + $0x380] ss:$16 sps:$4 sm:$0xff]   ;;  %v4032_v49 = vld [vmem:[#allocation4 + $0x364] ss:$16 sps:$4 sm:$0xff]  }
 0x105   :  { %2630 = vmatprep.subr.bf16.mxu1 %v3972_v60 }
 0x106   :  { %1783 = vmatmul.mubr.bf16.vlgmr.msra.gmra.mxu0 %v4122_v53  ;;  %v3948_v53 = vld [vmem:[#allocation4 + $0xec] ss:$16 sps:$4 sm:$0xff]  }
 0x107   :  { %1742 = vmatmul.mubr.bf16.vlgmr.msra.gmra.mxu1 %v4279_v15  ;;  %2590 = vmatpush1.bf16.msra.mxu0 %v3898_v50  ;;  %v3910_v15 = vld [vmem:[#allocation4 + $0x60] ss:$16 sps:$4 sm:$0xff]  }
 0x108   :  { %2591 = vmatprep.subr.bf16.mxu0 %v3903_v52  ;;  %2631 = vmatpush1.bf16.msra.mxu1 %v3970_v59  ;;  %v3943_v50 = vld [vmem:[#allocation4 + $0x100] ss:$16 sps:$4 sm:$0xff]  }
 0x109   :  { %2632 = vmatprep.subr.bf16.mxu1 %v3978_v47  ;;  %v4030_v52 = vld [vmem:[#allocation4 + $0x360] ss:$16 sps:$4 sm:$0xff]   ;;  %v4044_v47 = vld [vmem:[#allocation4 + $0x2ec] ss:$16 sps:$4 sm:$0xff]  }
 0x10a   :  { %v4036_v59 = vld [vmem:[#allocation4 + $0x320] ss:$16 sps:$4 sm:$0xff]  }
 0x10b   :  { %2592 = vmatpush1.bf16.msra.mxu0 %v3901_v54  ;;  %v4035_v54 = vld [vmem:[#allocation4 + $0x344] ss:$16 sps:$4 sm:$0xff]  }
 0x10c   :  { %2593 = vmatprep.subr.bf16.mxu0 %v3906_v55  ;;  %2633 = vmatpush1.bf16.msra.mxu1 %v3976_v62  ;;  %v4033_v55 = vld [vmem:[#allocation4 + $0x340] ss:$16 sps:$4 sm:$0xff]  }
 0x10d   :  { %2634 = vmatprep.subr.bf16.mxu1 %v3984_v1  ;;  %v4039_v62 = vld [vmem:[#allocation4 + $0x300] ss:$16 sps:$4 sm:$0xff]  }
 0x10e   :  { %v4305_v1 = vld [vmem:[%s4353_s2] sm:$0xf] }
 0x10f   :  { %2594 = vmatpush1.bf16.msra.mxu0 %v3904_v56 }
 0x110   :  { %2595 = vmatprep.subr.bf16.mxu0 %v3909_v57  ;;  %2635 = vmatpush1.bf16.msra.mxu1 %v3982_v0 }
 0x111   :  { %2636 = vmatprep.subr.bf16.mxu1 %v3990_v35 }
 0x113   :  { %2596 = vmatpush1.bf16.msra.mxu0 %v3907_v58  ;;  %v4038_v58 = vld [vmem:[#allocation4 + $0x324] ss:$16 sps:$4 sm:$0xff]  }
 0x114   :  { %2597 = vmatprep.subr.bf16.mxu0 %v3912_v61  ;;  %2637 = vmatpush1.bf16.msra.mxu1 %v3988_v4 }
 0x115   :  { %2638 = vmatprep.subr.bf16.mxu1 %v3996_v10 }
 0x117   :  { %2598 = vmatpush1.bf16.msra.mxu0 %v3910_v15  ;;  %v4041_v15 = vld [vmem:[#allocation4 + $0x304] ss:$16 sps:$4 sm:$0xff]  }
 0x118   :  { %2599 = vmatprep.subr.bf16.mxu0 %v3915_v6  ;;  %2639 = vmatpush1.bf16.msra.mxu1 %v3994_v9  ;;  %v298_v6 = vlaneseq }
 0x119   :  { %2640 = vmatprep.subr.bf16.mxu1 %v4002_v14 }
 0x11b   :  { %2600 = vmatpush1.bf16.msra.mxu0 %v3913_v63  ;;  %v4299_v63 = vshrl.u32 %v298_v6, 7 }
 0x11c   :  { %2601 = vmatprep.subr.bf16.mxu0 %v3918_v2  ;;  %2641 = vmatpush1.bf16.msra.mxu1 %v4000_v13 }
 0x11d   :  { %2642 = vmatprep.subr.bf16.mxu1 %v4008_v24  ;;  %v300_v0 = vsub.s32 0, %v4299_v63  ;;  %v304_v2 = vsub.s32 1, %v4299_v63 }
 0x11f   :  { %2602 = vmatpush1.bf16.msra.mxu0 %v3916_v3  ;;  %v301_v3 = vrot.slane %v4305_v1, %v300_v0  ;;  %v305_v4 = vrot.slane %v4305_v1, %v304_v2 }
 0x120   :  { %2603 = vmatprep.subr.bf16.mxu0 %v3921_v5  ;;  %2643 = vmatpush1.bf16.msra.mxu1 %v4006_v25 }
 0x121   :  { %2644 = vmatprep.subr.bf16.mxu1 %v4014_v33  ;;  %v3963_v33 = vld [vmem:[#allocation4 + $0x4c] ss:$16 sps:$4 sm:$0xff]  }
 0x123   :  { %2604 = vmatpush1.bf16.msra.mxu0 %v3919_v8 }
 0x124   :  { %2605 = vmatprep.subr.bf16.mxu0 %v3924_v11  ;;  %2645 = vmatpush1.bf16.msra.mxu1 %v4012_v32  ;;  %v3958_v32 = vld [vmem:[#allocation4 + $0x68] ss:$16 sps:$4 sm:$0xff]  }
 0x125   :  { %2646 = vmatprep.subr.bf16.mxu1 %v4020_v34 }
 0x126   :  { %v4291_v18 = vpop.f32.mrf.mxu0 }
 0x127   :  { %v4293_v19 = vpop.f32.mrf.mxu1  ;;  %2606 = vmatpush2.bf16.msra.mxu0 %v3922_v12  ;;  %v1498_v35 = vadd.f32 %v4291_v18, %v301_v3  ;;  %v3951_v18 = vld [vmem:[#allocation4 + $0xcc] ss:$16 sps:$4 sm:$0xff]  }
 0x128   :  { %v4295_v21 = vpop.f32.mrf.mxu0  ;;  %2607 = vmatprep.subr.bf16.mxu0 %v3927_v17  ;;  %2647 = vmatpush2.bf16.msra.mxu1 %v4018_v51  ;;  %v3966_v51 = vld [vmem:[#allocation4 + $0x2c] ss:$16 sps:$4 sm:$0xff]  }
 0x129   :  { %v4297_v22 = vpop.f32.mrf.mxu1  ;;  %2648 = vmatprep.subr.bf16.mxu1 %v4023_v37  ;;  %v1500_v5 = vadd.f32 %v4295_v21, %v305_v4  ;;  %v1539_v8 = vadd.f32 %v4293_v19, %v1498_v35  ;;  %v3949_v19 = vld [vmem:[#allocation4 + $0xc8] ss:$16 sps:$4 sm:$0xff]   ;;  %v3954_v21 = vld [vmem:[#allocation4 + $0xac] ss:$16 sps:$4 sm:$0xff]  }
 0x12a   :  { %v1501_v26 = vpop.f32.mrf.mxu0 }
 0x12b   :  { %v1542_v27 = vpop.f32.mrf.mxu1  ;;  %2608 = vmatpush2.bf16.msra.mxu0 %v3925_v20  ;;  %v1541_v10 = vadd.f32 %v4297_v22, %v1500_v5  ;;  %v3952_v22 = vld [vmem:[#allocation4 + $0xa8] ss:$16 sps:$4 sm:$0xff]  }
 0x12c   :  { %v1502_v29 = vpop.f32.mrf.mxu0  ;;  %2609 = vmatprep.subr.bf16.mxu0 %v3930_v23  ;;  %2649 = vmatpush2.bf16.msra.mxu1 %v4021_v38  ;;  %v3946_v27 = vld [vmem:[#allocation4 + $0xe8] ss:$16 sps:$4 sm:$0xff]  }
 0x12d   :  { %v1543_v30 = vpop.f32.mrf.mxu1  ;;  %2650 = vmatprep.subr.bf16.mxu1 %v4026_v40  ;;  %v3957_v29 = vld [vmem:[#allocation4 + $0x8c] ss:$16 sps:$4 sm:$0xff]  }
 0x12e   :  { %v3955_v30 = vld [vmem:[#allocation4 + $0x88] ss:$16 sps:$4 sm:$0xff]  }
 0x12f   :  { %2610 = vmatpush2.bf16.msra.mxu0 %v3928_v28 }
 0x130   :  { %2611 = vmatprep.subr.bf16.mxu0 %v3933_v31  ;;  %2651 = vmatpush2.bf16.msra.mxu1 %v4024_v42  ;;  %v3960_v31 = vld [vmem:[#allocation4 + $0x6c] ss:$16 sps:$4 sm:$0xff]   ;;  %v3973_v42 = vld [vmem:[#allocation4 + $0x1e8] ss:$16 sps:$4 sm:$0xff]  }
 0x131   :  { %2652 = vmatprep.subr.bf16.mxu1 %v4029_v44  ;;  %v3979_v44 = vld [vmem:[#allocation4 + $0x1c8] ss:$16 sps:$4 sm:$0xff]  }
 0x133   :  { %2612 = vmatpush2.bf16.msra.mxu0 %v3931_v7  ;;  %v3961_v7 = vld [vmem:[#allocation4 + $0x48] ss:$16 sps:$4 sm:$0xff]  }
 0x134   :  { %2613 = vmatprep.subr.bf16.mxu0 %v3936_v36  ;;  %2653 = vmatpush2.bf16.msra.mxu1 %v4027_v46  ;;  %v3964_v36 = vld [vmem:[#allocation4 + $0x28] ss:$16 sps:$4 sm:$0xff]  }
 0x135   :  { %2654 = vmatprep.subr.bf16.mxu1 %v4032_v49  ;;  %v3985_v46 = vld [vmem:[#allocation4 + $0x1a8] ss:$16 sps:$4 sm:$0xff]  }
 0x136   :  { %v3991_v49 = vld [vmem:[#allocation4 + $0x188] ss:$16 sps:$4 sm:$0xff]  }
 0x137   :  { %2614 = vmatpush2.bf16.msra.mxu0 %v3934_v16  ;;  %v3969_v16 = vld [vmem:[#allocation4 + $0xc] ss:$16 sps:$4 sm:$0xff]  }
 0x138   :  { %2615 = vmatprep.subr.bf16.mxu0 %v3939_v39  ;;  %2655 = vmatpush2.bf16.msra.mxu1 %v4030_v52  ;;  %v3967_v39 = vld [vmem:[#allocation4 + $0x8] ss:$16 sps:$4 sm:$0xff]  }
 0x139   :  { %2656 = vmatprep.subr.bf16.mxu1 %v4035_v54  ;;  %v3997_v52 = vld [vmem:[#allocation4 + $0x168] ss:$16 sps:$4 sm:$0xff]  }
 0x13a   :  { %v4003_v54 = vld [vmem:[#allocation4 + $0x148] ss:$16 sps:$4 sm:$0xff]  }
 0x13b   :  { %2616 = vmatpush2.bf16.msra.mxu0 %v3937_v41  ;;  %v3975_v41 = vld [vmem:[#allocation4 + $0x1ec] ss:$16 sps:$4 sm:$0xff]  }
 0x13c   :  { %2617 = vmatprep.subr.bf16.mxu0 %v3942_v43  ;;  %2657 = vmatpush2.bf16.msra.mxu1 %v4033_v55  ;;  %v3981_v43 = vld [vmem:[#allocation4 + $0x1cc] ss:$16 sps:$4 sm:$0xff]  }
 0x13d   :  { %2658 = vmatprep.subr.bf16.mxu1 %v4038_v58  ;;  %v4011_v55 = vld [vmem:[#allocation4 + $0x12c] ss:$16 sps:$4 sm:$0xff]  }
 0x13f   :  { %2618 = vmatpush2.bf16.msra.mxu0 %v3940_v45  ;;  %v3987_v45 = vld [vmem:[#allocation4 + $0x1ac] ss:$16 sps:$4 sm:$0xff]  }
 0x140   :  { %2619 = vmatprep.subr.bf16.mxu0 %v3945_v48  ;;  %2659 = vmatpush2.bf16.msra.mxu1 %v4036_v59  ;;  %v3993_v48 = vld [vmem:[#allocation4 + $0x18c] ss:$16 sps:$4 sm:$0xff]  }
 0x141   :  { %2660 = vmatprep.subr.bf16.mxu1 %v4041_v15  ;;  %v4017_v59 = vld [vmem:[#allocation4 + $0x10c] ss:$16 sps:$4 sm:$0xff]  }
 0x143   :  { %2620 = vmatpush2.bf16.msra.mxu0 %v3943_v50  ;;  %v3999_v50 = vld [vmem:[#allocation4 + $0x16c] ss:$16 sps:$4 sm:$0xff]  }
 0x144   :  { %2671 = vmatprep.subr.bf16.mxu0 %v3948_v53  ;;  %2661 = vmatpush2.bf16.msra.mxu1 %v4039_v62  ;;  %v4005_v53 = vld [vmem:[#allocation4 + $0x14c] ss:$16 sps:$4 sm:$0xff]   ;;  %v308_v62 = vsub.s32 2, %v4299_v63 }
 0x145   :  { %2712 = vmatprep.subr.bf16.mxu1 %v4044_v47  ;;  %v312_v47 = vsub.s32 3, %v4299_v63 }
 0x146   :  { %v309_v6 = vrot.slane %v4305_v1, %v308_v62 }
 0x147   :  { %v1620_v56 = vpop.f32.mrf.mxu1  ;;  %v313_v3 = vrot.slane %v4305_v1, %v312_v47  ;;  %v4042_v1 = vld [vmem:[#allocation4 + $0x2e8] ss:$16 sps:$4 sm:$0xff]  }
 0x149   :  { %v1622_v57 = vpop.f32.mrf.mxu1 }
 0x14b   :  { %v1624_v60 = vpop.f32.mrf.mxu1 }
 0x14d   :  { %v1625_v61 = vpop.f32.mrf.mxu1 }
 0x14e   :  { %v4015_v61 = vld [vmem:[#allocation4 + $0x108] ss:$16 sps:$4 sm:$0xff]  }
 0x166   :  { %v1579_v9 = vpop.f32.mrf.mxu0 }
 0x167   :  { %v1580_v11 = vadd.f32 %v1579_v9, %v1539_v8 }
 0x168   :  { %v1581_v12 = vpop.f32.mrf.mxu0 }
 0x169   :  { %v1621_v13 = vadd.f32 %v1620_v56, %v1580_v11  ;;  %v1582_v14 = vadd.f32 %v1581_v12, %v1541_v10 }
 0x16a   :  { %v1583_v17 = vpop.f32.mrf.mxu0 }
 0x16b   :  { %v1623_v20 = vadd.f32 %v1622_v57, %v1582_v14  ;;  %v1791_v23 = vmax.f32 %v1621_v13, 0.0  ;;  %v4009_v57 = vld [vmem:[#allocation4 + $0x128] ss:$16 sps:$4 sm:$0xff]  }
 0x16c   :  { %v1584_v24 = vpop.f32.mrf.mxu0 }
 0x16d   :  { %v1792_v25 = vmax.f32 %v1623_v20, 0.0  ;;  %v4318_v28 = vpack.c.bf16 %v1791_v23, %v1791_v23 }
 0x16f   :  { %v1796_v26 = vpack.c.bf16 %v1792_v25, %v1792_v25 }
 0x171   :  { %2621 = vmatprep.mubr.bf16.mxu0 %v1796_v26 }
 0x172   :  { %2622 = vmatmul.mubr.bf16.vlgmr.msra.gmra.mxu0 %v4318_v28 }
 0x173   :  { %2672 = vmatpush1.bf16.msra.mxu0 %v3946_v27  ;;  %2703 = vmatprep.mubr.bf16.mxu0 %v1796_v26 }
 0x174   :  { %2673 = vmatprep.subr.bf16.mxu0 %v3951_v18 }
 0x177   :  { %2674 = vmatpush1.bf16.msra.mxu0 %v3949_v19 }
 0x178   :  { %2675 = vmatprep.subr.bf16.mxu0 %v3954_v21  ;;  %v4047_v21 = vld [vmem:[#allocation4 + $0x2cc] ss:$16 sps:$4 sm:$0xff]  }
 0x17b   :  { %2676 = vmatpush1.bf16.msra.mxu0 %v3952_v22  ;;  %v4045_v22 = vld [vmem:[#allocation4 + $0x2c8] ss:$16 sps:$4 sm:$0xff]  }
 0x17c   :  { %2677 = vmatprep.subr.bf16.mxu0 %v3957_v29  ;;  %v4050_v29 = vld [vmem:[#allocation4 + $0x2ac] ss:$16 sps:$4 sm:$0xff]  }
 0x17f   :  { %2678 = vmatpush1.bf16.msra.mxu0 %v3955_v30  ;;  %v4048_v30 = vld [vmem:[#allocation4 + $0x2a8] ss:$16 sps:$4 sm:$0xff]  }
 0x180   :  { %2679 = vmatprep.subr.bf16.mxu0 %v3960_v31  ;;  %v4053_v31 = vld [vmem:[#allocation4 + $0x28c] ss:$16 sps:$4 sm:$0xff]  }
 0x183   :  { %2680 = vmatpush1.bf16.msra.mxu0 %v3958_v32  ;;  %v4051_v32 = vld [vmem:[#allocation4 + $0x288] ss:$16 sps:$4 sm:$0xff]  }
 0x184   :  { %2681 = vmatprep.subr.bf16.mxu0 %v3963_v33  ;;  %v4056_v33 = vld [vmem:[#allocation4 + $0x26c] ss:$16 sps:$4 sm:$0xff]  }
 0x187   :  { %v1661_v34 = vpop.f32.mrf.mxu1  ;;  %2682 = vmatpush1.bf16.msra.mxu0 %v3961_v7  ;;  %v4054_v7 = vld [vmem:[#allocation4 + $0x268] ss:$16 sps:$4 sm:$0xff]  }
 0x188   :  { %2683 = vmatprep.subr.bf16.mxu0 %v3966_v51  ;;  %v1662_v4 = vadd.f32 %v1661_v34, %v309_v6  ;;  %v4059_v51 = vld [vmem:[#allocation4 + $0x24c] ss:$16 sps:$4 sm:$0xff]   ;;  %v4057_v34 = vld [vmem:[#allocation4 + $0x248] ss:$16 sps:$4 sm:$0xff]  }
 0x189   :  { %v1663_v37 = vpop.f32.mrf.mxu1  ;;  %v4084_v6 = vld [vmem:[#allocation4 + $0x328] ss:$16 sps:$4 sm:$0xff]  }
 0x18a   :  { %v1664_v35 = vadd.f32 %v1663_v37, %v313_v3  ;;  %v4060_v37 = vld [vmem:[#allocation4 + $0x228] ss:$16 sps:$4 sm:$0xff]  }
 0x18b   :  { %v1665_v38 = vpop.f32.mrf.mxu1  ;;  %2684 = vmatpush1.bf16.msra.mxu0 %v3964_v36  ;;  %v4062_v36 = vld [vmem:[#allocation4 + $0x22c] ss:$16 sps:$4 sm:$0xff]  }
 0x18c   :  { %2685 = vmatprep.subr.bf16.mxu0 %v3969_v16  ;;  %v4065_v16 = vld [vmem:[#allocation4 + $0x20c] ss:$16 sps:$4 sm:$0xff]   ;;  %v4063_v38 = vld [vmem:[#allocation4 + $0x208] ss:$16 sps:$4 sm:$0xff]  }
 0x18d   :  { %v1666_v40 = vpop.f32.mrf.mxu1  ;;  %v4099_v3 = vld [vmem:[#allocation6 + $0x18] sm:$0xff]  }
 0x18e   :  { %v4066_v40 = vld [vmem:[#allocation4 + $0x3e8] ss:$16 sps:$4 sm:$0xff]  }
 0x18f   :  { %2686 = vmatpush1.bf16.msra.mxu0 %v3967_v39  ;;  %v4068_v39 = vld [vmem:[#allocation4 + $0x3ec] ss:$16 sps:$4 sm:$0xff]  }
 0x190   :  { %2687 = vmatprep.subr.bf16.mxu0 %v3975_v41  ;;  %v4071_v41 = vld [vmem:[#allocation4 + $0x3cc] ss:$16 sps:$4 sm:$0xff]  }
 0x193   :  { %2688 = vmatpush2.bf16.msra.mxu0 %v3973_v42  ;;  %v4069_v42 = vld [vmem:[#allocation4 + $0x3c8] ss:$16 sps:$4 sm:$0xff]  }
 0x194   :  { %2689 = vmatprep.subr.bf16.mxu0 %v3981_v43  ;;  %v4074_v43 = vld [vmem:[#allocation4 + $0x3ac] ss:$16 sps:$4 sm:$0xff]  }
 0x197   :  { %2690 = vmatpush2.bf16.msra.mxu0 %v3979_v44  ;;  %v4072_v44 = vld [vmem:[#allocation4 + $0x3a8] ss:$16 sps:$4 sm:$0xff]  }
 0x198   :  { %2691 = vmatprep.subr.bf16.mxu0 %v3987_v45  ;;  %v4077_v45 = vld [vmem:[#allocation4 + $0x38c] ss:$16 sps:$4 sm:$0xff]  }
 0x19b   :  { %2692 = vmatpush2.bf16.msra.mxu0 %v3985_v46  ;;  %v4090_v46 = vld [vmem:[#allocation6 + $0x78] sm:$0xff]  }
 0x19c   :  { %2693 = vmatprep.subr.bf16.mxu0 %v3993_v48  ;;  %v4091_v48 = vld [vmem:[#allocation6 + $0x38] sm:$0xff]  }
 0x19f   :  { %2694 = vmatpush2.bf16.msra.mxu0 %v3991_v49  ;;  %v4092_v49 = vld [vmem:[#allocation6 + $0x70] sm:$0xff]  }
 0x1a0   :  { %2695 = vmatprep.subr.bf16.mxu0 %v3999_v50  ;;  %v4075_v50 = vld [vmem:[#allocation4 + $0x388] ss:$16 sps:$4 sm:$0xff]  }
 0x1a3   :  { %2696 = vmatpush2.bf16.msra.mxu0 %v3997_v52  ;;  %v4093_v52 = vld [vmem:[#allocation6 + $0x30] sm:$0xff]  }
 0x1a4   :  { %2697 = vmatprep.subr.bf16.mxu0 %v4005_v53  ;;  %v4080_v53 = vld [vmem:[#allocation4 + $0x36c] ss:$16 sps:$4 sm:$0xff]  }
 0x1a6   :  { %v1702_v56 = vpop.f32.mrf.mxu0 }
 0x1a7   :  { %2698 = vmatpush2.bf16.msra.mxu0 %v4003_v54  ;;  %v1703_v5 = vadd.f32 %v1702_v56, %v1662_v4  ;;  %v4094_v54 = vld [vmem:[#allocation6 + $0x68] sm:$0xff]  }
 0x1a8   :  { %v1704_v58 = vpop.f32.mrf.mxu0  ;;  %2699 = vmatprep.subr.bf16.mxu0 %v4011_v55  ;;  %v4078_v55 = vld [vmem:[#allocation4 + $0x368] ss:$16 sps:$4 sm:$0xff]   ;;  %v4089_v4 = vld [vmem:[#allocation4 + $0x30c] ss:$16 sps:$4 sm:$0xff]  }
 0x1a9   :  { %v1705_v10 = vadd.f32 %v1704_v58, %v1664_v35  ;;  %v4095_v56 = vld [vmem:[#allocation6 + $0x28] sm:$0xff]   ;;  %v4096_v58 = vld [vmem:[#allocation6 + $0x60] sm:$0xff]   ;;  %v4100_v35 = vld [vmem:[#allocation6 + $0x50] sm:$0xff]  }
 0x1aa   :  { %v1706_v60 = vpop.f32.mrf.mxu0 }
 0x1ab   :  { %2700 = vmatpush2.bf16.msra.mxu0 %v4009_v57  ;;  %v4083_v57 = vld [vmem:[#allocation4 + $0x34c] ss:$16 sps:$4 sm:$0xff]   ;;  %v4097_v60 = vld [vmem:[#allocation6 + $0x20] sm:$0xff]  }
 0x1ac   :  { %v1707_v15 = vpop.f32.mrf.mxu0  ;;  %2701 = vmatprep.subr.bf16.mxu0 %v4017_v59  ;;  %v4081_v59 = vld [vmem:[#allocation4 + $0x348] ss:$16 sps:$4 sm:$0xff]  }
 0x1ad   :  { %v4098_v15 = vld [vmem:[#allocation6 + $0x58] sm:$0xff]  }
 0x1af   :  { %2702 = vmatpush2.bf16.msra.mxu0 %v4015_v61  ;;  %v4086_v61 = vld [vmem:[#allocation4 + $0x32c] ss:$16 sps:$4 sm:$0xff]  }
 0x1b0   :  { %3503 = vmatprep.subr.bf16.mxu0 %v4090_v46 }
 0x1b2   :  { %2704 = vmatmul.mubr.bf16.vlgmr.msra.gmra.mxu0 %v4318_v28 }
 0x1b3   :  { %3504 = vmatpush3.bf16.msra.mxu0 %v4091_v48 }
 0x1b4   :  { %3505 = vmatprep.subr.bf16.mxu0 %v4092_v49 }
 0x1b7   :  { %3506 = vmatpush3.bf16.msra.mxu0 %v4093_v52 }
 0x1b8   :  { %3507 = vmatprep.subr.bf16.mxu0 %v4094_v54 }
 0x1bb   :  { %3508 = vmatpush3.bf16.msra.mxu0 %v4095_v56 }
 0x1bc   :  { %3509 = vmatprep.subr.bf16.mxu0 %v4096_v58 }
 0x1bf   :  { %3510 = vmatpush3.bf16.msra.mxu0 %v4097_v60 }
 0x1c0   :  { %3511 = vmatprep.subr.bf16.mxu0 %v4098_v15 }
 0x1c3   :  { %3512 = vmatpush3.bf16.msra.mxu0 %v4099_v3 }
 0x1c4   :  { %3513 = vmatprep.subr.bf16.mxu0 %v4100_v35 }
 0x1c6   :  { %v1784_v9 = vpop.f32.mrf.mxu0 }
 0x1c7   :  { %v1743_v8 = vpop.f32.mrf.mxu1 }
 0x1c8   :  { %v1744_v11 = vadd.f32 %v1743_v8, %v1703_v5  ;;  %v1786_v13 = vpop.f32.mrf.mxu0  ;;  %v4087_v5 = vld [vmem:[#allocation4 + $0x308] ss:$16 sps:$4 sm:$0xff]   ;;  %v4101_v8 = vld [vmem:[#allocation6 + $0x10] sm:$0xff]  }
 0x1c9   :  { %v1745_v12 = vpop.f32.mrf.mxu1  ;;  %3514 = vmatpush3.bf16.msra.mxu0 %v4101_v8 }
 0x1ca   :  { %v1785_v14 = vadd.f32 %v1784_v9, %v1744_v11  ;;  %v1746_v17 = vadd.f32 %v1745_v12, %v1705_v10  ;;  %v1788_v23 = vpop.f32.mrf.mxu0  ;;  %v4102_v9 = vld [vmem:[#allocation6 + $0x48] sm:$0xff]   ;;  %v4104_v11 = vld [vmem:[#allocation6 + $0x40] sm:$0xff]  }
 0x1cb   :  { %v1747_v20 = vpop.f32.mrf.mxu1  ;;  %v4103_v10 = vld [vmem:[#allocation6 + $0x8] sm:$0xff]   ;;  %3515 = vmatprep.subr.bf16.mxu0 %v4102_v9  ;;  %v4105_v12 = vld [vmem:[#allocation6] sm:$0xff]  }
 0x1cc   :  { %v1787_v24 = vadd.f32 %v1786_v13, %v1746_v17  ;;  %v1793_v25 = vmax.f32 %v1785_v14, 0.0  ;;  %v1789_v27 = vpop.f32.mrf.mxu0  ;;  %v4106_v13 = vld [vmem:[#allocation6 + $0xf8] sm:$0xff]   ;;  %v4108_v17 = vld [vmem:[#allocation6 + $0xf0] sm:$0xff]   ;;  %v4110_v23 = vld [vmem:[#allocation6 + $0xe8] sm:$0xff]  }
 0x1cd   :  { %v1748_v26 = vpop.f32.mrf.mxu1  ;;  %3516 = vmatpush3.bf16.msra.mxu0 %v4103_v10  ;;  %v4107_v14 = vld [vmem:[#allocation6 + $0xb8] sm:$0xff]   ;;  %v4109_v20 = vld [vmem:[#allocation6 + $0xb0] sm:$0xff]  }
 0x1ce   :  { %v1794_v28 = vmax.f32 %v1787_v24, 0.0  ;;  %v4330_v19 = vpack.c.bf16 %v1793_v25, %v1793_v25  ;;  %3517 = vmatprep.subr.bf16.mxu0 %v4104_v11  ;;  %v4111_v24 = vld [vmem:[#allocation6 + $0xa8] sm:$0xff]   ;;  %v4112_v25 = vld [vmem:[#allocation6 + $0xe0] sm:$0xff]   ;;  %v4114_v27 = vld [vmem:[#allocation6 + $0xd8] sm:$0xff]  }
 0x1cf   :  { %v4113_v26 = vld [vmem:[#allocation6 + $0xa0] sm:$0xff]  }
 0x1d0   :  { %v1798_v18 = vpack.c.bf16 %v1794_v28, %v1794_v28  ;;  %v4115_v28 = vld [vmem:[#allocation6 + $0x98] sm:$0xff]  }
 0x1d1   :  { %3518 = vmatpush3.bf16.msra.mxu0 %v4105_v12 }
 0x1d2   :  { %2662 = vmatprep.mubr.bf16.mxu1 %v1798_v18 }
 0x1d3   :  { %2663 = vmatmul.mubr.bf16.vlgmr.msra.gmra.mxu1 %v4330_v19 }
 0x1d4   :  { %2713 = vmatpush1.bf16.msra.mxu1 %v4042_v1  ;;  %2744 = vmatprep.mubr.bf16.mxu1 %v1798_v18  ;;  %v4116_v18 = vld [vmem:[#allocation6 + $0xd0] sm:$0xff]  }
 0x1d5   :  { %2714 = vmatprep.subr.bf16.mxu1 %v4047_v21  ;;  %v4117_v1 = vld [vmem:[#allocation6 + $0x90] sm:$0xff]  }
 0x1d8   :  { %2715 = vmatpush1.bf16.msra.mxu1 %v4045_v22 }
 0x1d9   :  { %2716 = vmatprep.subr.bf16.mxu1 %v4050_v29 }
 0x1dc   :  { %2717 = vmatpush1.bf16.msra.mxu1 %v4048_v30  ;;  %v4118_v30 = vld [vmem:[#allocation6 + $0xc8] sm:$0xff]  }
 0x1dd   :  { %2718 = vmatprep.subr.bf16.mxu1 %v4053_v31  ;;  %v4119_v31 = vld [vmem:[#allocation6 + $0x88] sm:$0xff]  }
 0x1e0   :  { %2719 = vmatpush1.bf16.msra.mxu1 %v4051_v32  ;;  %v4120_v32 = vld [vmem:[#allocation6 + $0xc0] sm:$0xff]  }
 0x1e1   :  { %2720 = vmatprep.subr.bf16.mxu1 %v4056_v33  ;;  %v4121_v33 = vld [vmem:[#allocation6 + $0x80] sm:$0xff]  }
 0x1e4   :  { %2721 = vmatpush1.bf16.msra.mxu1 %v4054_v7 }
 0x1e5   :  { %2722 = vmatprep.subr.bf16.mxu1 %v4059_v51 }
 0x1e8   :  { %2723 = vmatpush1.bf16.msra.mxu1 %v4057_v34 }
 0x1e9   :  { %2724 = vmatprep.subr.bf16.mxu1 %v4062_v36 }
 0x1ec   :  { %2725 = vmatpush1.bf16.msra.mxu1 %v4060_v37  ;;  %v1927_v37 = vld [vmem:[%s4355_s4] sm:$0xf] }
 0x1ed   :  { %2726 = vmatprep.subr.bf16.mxu1 %v4065_v16  ;;  %v1932_v16 = vrot.slane %v1927_v37, %v300_v0  ;;  %v1940_v0 = vrot.slane %v1927_v37, %v308_v62 }
 0x1f0   :  { %2727 = vmatpush1.bf16.msra.mxu1 %v4063_v38  ;;  %v1936_v38 = vrot.slane %v1927_v37, %v304_v2  ;;  %v1944_v2 = vrot.slane %v1927_v37, %v312_v47  ;;  %v3470_v47 = vld [vmem:[%s4357_s6] ss:$0 sm:$0xff] }
 0x1f1   :  { %2728 = vmatprep.subr.bf16.mxu1 %v4068_v39 }
 0x1f4   :  { %2729 = vmatpush2.bf16.msra.mxu1 %v4066_v40 }
 0x1f5   :  { %2730 = vmatprep.subr.bf16.mxu1 %v4071_v41 }
 0x1f8   :  { %2731 = vmatpush2.bf16.msra.mxu1 %v4069_v42 }
 0x1f9   :  { %2732 = vmatprep.subr.bf16.mxu1 %v4074_v43 }
 0x1fc   :  { %2733 = vmatpush2.bf16.msra.mxu1 %v4072_v44 }
 0x1fd   :  { %2734 = vmatprep.subr.bf16.mxu1 %v4077_v45 }
 0x200   :  { %2735 = vmatpush2.bf16.msra.mxu1 %v4075_v50 }
 0x201   :  { %2736 = vmatprep.subr.bf16.mxu1 %v4080_v53 }
 0x204   :  { %2737 = vmatpush2.bf16.msra.mxu1 %v4078_v55 }
 0x205   :  { %2738 = vmatprep.subr.bf16.mxu1 %v4083_v57 }
 0x208   :  { %2739 = vmatpush2.bf16.msra.mxu1 %v4081_v59 }
 0x209   :  { %2740 = vmatprep.subr.bf16.mxu1 %v4086_v61 }
 0x20c   :  { %2741 = vmatpush2.bf16.msra.mxu1 %v4084_v6 }
 0x20d   :  { %2742 = vmatprep.subr.bf16.mxu1 %v4089_v4 }
 0x210   :  { %2743 = vmatpush2.bf16.msra.mxu1 %v4087_v5 }
 0x211   :  { %3525 = vmatprep.subr.bf16.mxu1 %v4106_v13 }
 0x213   :  { %2745 = vmatmul.mubr.bf16.vlgmr.msra.gmra.mxu1 %v4330_v19 }
 0x214   :  { %3526 = vmatpush3.bf16.msra.mxu1 %v4107_v14 }
 0x215   :  { %3527 = vmatprep.subr.bf16.mxu1 %v4108_v17 }
 0x218   :  { %3528 = vmatpush3.bf16.msra.mxu1 %v4109_v20 }
 0x219   :  { %3529 = vmatprep.subr.bf16.mxu1 %v4110_v23 }
 0x21c   :  { %3530 = vmatpush3.bf16.msra.mxu1 %v4111_v24 }
 0x21d   :  { %3531 = vmatprep.subr.bf16.mxu1 %v4112_v25 }
 0x220   :  { %3532 = vmatpush3.bf16.msra.mxu1 %v4113_v26 }
 0x221   :  { %3533 = vmatprep.subr.bf16.mxu1 %v4114_v27 }
 0x224   :  { %3534 = vmatpush3.bf16.msra.mxu1 %v4115_v28 }
 0x225   :  { %3535 = vmatprep.subr.bf16.mxu1 %v4116_v18 }
 0x228   :  { %3536 = vmatpush3.bf16.msra.mxu1 %v4117_v1 }
 0x229   :  { %3537 = vmatprep.subr.bf16.mxu1 %v4118_v30 }
 0x22c   :  { %3538 = vmatpush3.bf16.msra.mxu1 %v4119_v31 }
 0x22d   :  { %3539 = vmatprep.subr.bf16.mxu1 %v4120_v32 }
 0x230   :  { %3540 = vmatpush3.bf16.msra.mxu1 %v4121_v33 }
 0x232   :  { %v2623_v19 = vpop.f32.mrf.mxu0 }
 0x233   :  { %v2624_v39 = vadd.f32 %v2623_v19, %v1932_v16 }
 0x234   :  { %v2625_v21 = vpop.f32.mrf.mxu0 }
 0x235   :  { %v2626_v41 = vadd.f32 %v2625_v21, %v1936_v38 }
 0x236   :  { %v2627_v22 = vpop.f32.mrf.mxu0 }
 0x238   :  { %v2628_v29 = vpop.f32.mrf.mxu0 }
 0x272   :  { %v2705_v7 = vpop.f32.mrf.mxu0 }
 0x273   :  { %v2706_v53 = vadd.f32 %v2705_v7, %v1940_v0 }
 0x274   :  { %v2707_v51 = vpop.f32.mrf.mxu0 }
 0x275   :  { %v2708_v55 = vadd.f32 %v2707_v51, %v1944_v2 }
 0x276   :  { %v2709_v34 = vpop.f32.mrf.mxu0 }
 0x278   :  { %v2710_v36 = vpop.f32.mrf.mxu0 }
 0x293   :  { %v2664_v40 = vpop.f32.mrf.mxu1 }
 0x294   :  { %v2665_v42 = vadd.f32 %v2664_v40, %v2624_v39 }
 0x295   :  { %v2666_v43 = vpop.f32.mrf.mxu1 }
 0x296   :  { %v2667_v44 = vadd.f32 %v2666_v43, %v2626_v41  ;;  %v2753_v45 = vmax.f32 %v2665_v42, 0.0 }
 0x297   :  { %v2668_v46 = vpop.f32.mrf.mxu1 }
 0x298   :  { %v2754_v48 = vmax.f32 %v2667_v44, 0.0  ;;  %v2757_v52 = vpack.c.bf16 %v2753_v45, %v2753_v45 }
 0x299   :  { %v2669_v49 = vpop.f32.mrf.mxu1 }
 0x29a   :  { %v2758_v50 = vpack.c.bf16 %v2754_v48, %v2754_v48 }
 0x29c   :  { %3056 = vmatprep.mubr.bf16.mxu0 %v2758_v50 }
 0x29d   :  { %3057 = vmatmul.mubr.bf16.vlgmr.msra.gmra.mxu0 %v2757_v52 }
 0x2d3   :  { %v2746_v54 = vpop.f32.mrf.mxu1 }
 0x2d4   :  { %v2747_v56 = vadd.f32 %v2746_v54, %v2706_v53 }
 0x2d5   :  { %v2748_v57 = vpop.f32.mrf.mxu1 }
 0x2d6   :  { %v2749_v58 = vadd.f32 %v2748_v57, %v2708_v55  ;;  %v2755_v59 = vmax.f32 %v2747_v56, 0.0 }
 0x2d7   :  { %v2750_v60 = vpop.f32.mrf.mxu1 }
 0x2d8   :  { %v2756_v61 = vmax.f32 %v2749_v58, 0.0  ;;  %v2759_v3 = vpack.c.bf16 %v2755_v59, %v2755_v59 }
 0x2d9   :  { %v2751_v15 = vpop.f32.mrf.mxu1 }
 0x2da   :  { %v2760_v6 = vpack.c.bf16 %v2756_v61, %v2756_v61 }
 0x2dc   :  { %3096 = vmatprep.mubr.bf16.mxu1 %v2760_v6 }
 0x2dd   :  { %3097 = vmatmul.mubr.bf16.vlgmr.msra.gmra.mxu1 %v2759_v3 }
 0x35d   :  { %v3519_v4 = vpop.f32.mrf.mxu0 }
 0x35f   :  { %v3520_v35 = vpop.f32.mrf.mxu0 }
 0x360   :  { %v3521_v63 = vadd.f32 %v3520_v35, %v3519_v4 }
 0x361   :  { %v3522_v62 = vpop.f32.mrf.mxu0 }
 0x362   :  { %v3059_v10 = vadd.f32 %v3521_v63, %v3470_v47 }
 0x363   :  { %v3523_v5 = vpop.f32.mrf.mxu0 }
 0x39d   :  { %v3541_v8 = vpop.f32.mrf.mxu1 }
 0x39f   :  { %v3542_v9 = vpop.f32.mrf.mxu1 }
 0x3a0   :  { %v3543_v11 = vadd.f32 %v3542_v9, %v3541_v8 }
 0x3a1   :  { %v3544_v12 = vpop.f32.mrf.mxu1 }
 0x3a2   :  { %v3099_v13 = vadd.f32 %v3543_v11, %v3059_v10 }
 0x3a3   :  { %v3545_v14 = vpop.f32.mrf.mxu1 }
 0x3a4   :  { %3104 = vst [vmem:[%s4358_s7] sm:$0xff] %v3099_v13 }
 0x3a5   :  { %3109 = vsyncpa [#allocation3], 1 }
 0x3a6   :  { %3110 = vsyncpa [#allocation5], 1 }

</bundles_post_ra>
